<compile_context>
chip_gen: v7x
topology: tpu7x:2x2x1
jax: 0.10.0
libtpu: 0.0.40
codegen_flags: <defaults>
</compile_context>

<pallas_src>
import jax
import jax.numpy as jnp
import numpy as np
from jax.experimental import pallas as pl
from jax.experimental.pallas import tpu as pltpu

# ---------------- config (synthetic, deterministic) ----------------
EMB_DIM = 16                      # shot_embeddings_dim   (gembedding)
N_FOURIER = 2                     # transform_n_fourier_freqs
SEMB_DIM = 6 * N_FOURIER          # 12                    (sembedding)
SH0_DIM = 3
OPA_DIM = 1
FEAT_IN = SH0_DIM + OPA_DIM       # 4, 'inject' in feat_in_mlp
IN_DIM = EMB_DIM + FEAT_IN + SEMB_DIM   # 32
HIDDEN = 32                       # transform_hidden_dim
N_HIDDEN_LAYERS = 2               # transform_n_hidden_layers
OUT_DIMS = (3, 1)                 # [color, opacity]
COLOR_COEFF = 0.1                 # color_mlp_coeff
OPACITY_COEFF = 0.05              # opacity_mlp_coeff
FEAT_IN_MLP = "inject"

COMPUTE_DTYPE = jnp.bfloat16      # HBM->VMEM / MXU dtype; accumulation stays f32

_TM_MAX = 1024                    # row-tile sweep point (512-2048 all fit VMEM easily)


def _round_up(x, m):
    return ((x + m - 1) // m) * m


def _choose_tm(n):
    # Biggest tile that amortizes per-step overhead, but keep >= 2 grid steps
    # when possible so the 'parallel' axis can shard across v7x's two TCs.
    # Multiple of 16 for bf16 sublane-packing friendliness.
    half = _round_up(max((n + 1) // 2, 16), 16)
    return min(_TM_MAX, half)


# ---------------- Pallas kernel ----------------
def mlp_kernel(sh0_ref, opa_ref, g_ref, s_ref,
               w1a_ref, w1b_ref, w1c_ref, w1d_ref, b1_ref,
               w2_ref, b2_ref, w3c_ref, w3o_ref,
               color_ref, opa_out_ref):
    f32 = jnp.float32
    # Layer 1: fused-concat first layer -> sum of per-segment matmuls, f32 accumulation.
    h = jnp.dot(sh0_ref[...], w1a_ref[...], preferred_element_type=f32)
    h = h + jnp.dot(g_ref[...], w1c_ref[...], preferred_element_type=f32)
    h = h + jnp.dot(s_ref[...], w1d_ref[...], preferred_element_type=f32)
    # opacity is a single feature: rank-1 update via broadcast multiply on the VPU.
    h = h + opa_ref[...].astype(f32) * w1b_ref[...].astype(f32)
    h = jnp.maximum(h + b1_ref[...], 0.0)
    # Layer 2
    h = jnp.dot(h.astype(w2_ref.dtype), w2_ref[...], preferred_element_type=f32) + b2_ref[...]
    h = jnp.maximum(h, 0.0)
    # Layer 3 (bias-free; output scales already folded into the weights host-side).
    hb = h.astype(w3c_ref.dtype)
    color_ref[...] = jnp.dot(hb, w3c_ref[...], preferred_element_type=f32).astype(color_ref.dtype)
    opa_out_ref[...] = jnp.dot(hb, w3o_ref[...], preferred_element_type=f32).astype(opa_out_ref.dtype)


def mlp_pallas(sh0, opacity, gembedding, sembedding, kparams):
    n = sh0.shape[0]
    # bf16 transfers (no-op if producers already emit bf16).
    sh0, opacity, gembedding, sembedding = (
        a.astype(COMPUTE_DTYPE) for a in (sh0, opacity, gembedding, sembedding))

    tm = _choose_tm(n)
    n_pad = pl.cdiv(n, tm) * tm
    if n_pad != n:
        # Ragged remainder: pad rows (extra copy only paid when N % tm != 0).
        pad = lambda a: jnp.pad(a, ((0, n_pad - n), (0, 0)))
        sh0, opacity, gembedding, sembedding = map(pad, (sh0, opacity, gembedding, sembedding))

    w1a, w1b, w1c, w1d, b1, w2, b2, w3c, w3o = kparams

    def row_spec(d):
        return pl.BlockSpec((tm, d), lambda i: (i, 0))

    def const_spec(arr):
        return pl.BlockSpec(arr.shape, lambda i: (0, 0))

    color, opa = pl.pallas_call(
        mlp_kernel,
        out_shape=(jax.ShapeDtypeStruct((n_pad, OUT_DIMS[0]), jnp.float32),
                   jax.ShapeDtypeStruct((n_pad, OUT_DIMS[1]), jnp.float32)),
        grid_spec=pltpu.PrefetchScalarGridSpec(
            num_scalar_prefetch=0,
            grid=(n_pad // tm,),
            in_specs=[
                row_spec(SH0_DIM),        # sh0
                row_spec(OPA_DIM),        # opacity
                row_spec(EMB_DIM),        # gembedding
                row_spec(SEMB_DIM),       # sembedding
                const_spec(w1a), const_spec(w1b), const_spec(w1c), const_spec(w1d),
                const_spec(b1), const_spec(w2), const_spec(b2),
                const_spec(w3c), const_spec(w3o),
            ],
            out_specs=[row_spec(OUT_DIMS[0]), row_spec(OUT_DIMS[1])],
        ),
        compiler_params=pltpu.CompilerParams(
            dimension_semantics=("parallel",)),
    )(sh0, opacity, gembedding, sembedding,
      w1a, w1b, w1c, w1d, b1, w2, b2, w3c, w3o)

    if n_pad != n:
        color, opa = color[:n], opa[:n]
    return color, opa


# ---------------- parameter preparation (one-time constant folds) ----------------
def init_linear(key, fan_in, fan_out, zero=False):
    # torch.nn.Linear default init: U(-1/sqrt(fan_in), 1/sqrt(fan_in)).
    if zero:
        return jnp.zeros((fan_in, fan_out), jnp.float32), jnp.zeros((1, fan_out), jnp.float32)
    kw, kb = jax.random.split(key)
    bound = 1.0 / np.sqrt(fan_in)
    w = jax.random.uniform(kw, (fan_in, fan_out), jnp.float32, -bound, bound)
    b = jax.random.uniform(kb, (1, fan_out), jnp.float32, -bound, bound)
    return w, b


def prepare_params(w1, b1, w2, b2, w3):
    """Split W1 by input segment (fuses away the concat), fold output scales
    into the bias-free last layer, cast weights to bf16. Biases stay f32."""
    bf16 = COMPUTE_DTYPE
    # Row order of W1 must match cat(sh0, opacity, gembedding, sembedding).
    w1a = w1[0:SH0_DIM].astype(bf16)
    w1b = w1[SH0_DIM:SH0_DIM + OPA_DIM].astype(bf16)
    w1c = w1[FEAT_IN:FEAT_IN + EMB_DIM].astype(bf16)
    w1d = w1[FEAT_IN + EMB_DIM:].astype(bf16)
    w3c = (w3[:, :OUT_DIMS[0]] * COLOR_COEFF).astype(bf16)
    w3o = (w3[:, OUT_DIMS[0]:] * OPACITY_COEFF).astype(bf16)
    return (w1a, w1b, w1c, w1d, b1.astype(jnp.float32),
            w2.astype(bf16), b2.astype(jnp.float32), w3c, w3o)


# ---------------- forward (glue in plain JAX, compute in Pallas) ----------------
def color_opacity_mlp_forward(gembedding, sembedding, sh0, opacity, kparams):
    # feat_in_mlp = 'inject' -> input = cat(sh0, opacity, gembedding, sembedding);
    # the concat itself is fused into the kernel (W1 split per segment).
    # TODO(synk): 'inject-detach' only detaches sh0/opacity for gradients; forward identical.
    return mlp_pallas(sh0, opacity, gembedding, sembedding, kparams)


def mlp_reference(sh0, opacity, gembedding, sembedding, raw_params):
    inp = jnp.concatenate((sh0, opacity, gembedding, sembedding), axis=-1).astype(jnp.float32)
    w1, b1, w2, b2, w3 = raw_params
    h = jnp.maximum(inp @ w1 + b1, 0.0)
    h = jnp.maximum(h @ w2 + b2, 0.0)
    out = h @ w3
    return out[:, :OUT_DIMS[0]] * COLOR_COEFF, out[:, OUT_DIMS[0]:] * OPACITY_COEFF


if __name__ == "__main__":
    key = jax.random.PRNGKey(0)
    k_g, k_s, k_sh, k_o, k_l1, k_l2, k_l3 = jax.random.split(key, 7)

    N = 1000  # deliberately not a tile multiple -> exercises the padding path
    gembedding = jax.random.normal(k_g, (N, EMB_DIM), jnp.float32)
    sembedding = jax.random.normal(k_s, (N, SEMB_DIM), jnp.float32)
    sh0 = jax.random.normal(k_sh, (N, SH0_DIM), jnp.float32)
    opacity = jax.random.normal(k_o, (N, OPA_DIM), jnp.float32)

    # Module-faithful parameters: final layer bias-free and zero-initialized.
    w1, b1 = init_linear(k_l1, IN_DIM, HIDDEN)
    w2, b2 = init_linear(k_l2, HIDDEN, HIDDEN)
    w3, _ = init_linear(None, HIDDEN, sum(OUT_DIMS), zero=True)
    kparams = prepare_params(w1, b1, w2, b2, w3)

    color, opa = color_opacity_mlp_forward(gembedding, sembedding, sh0, opacity, kparams)
    color, opa = jax.block_until_ready((color, opa))
    assert color.shape == (N, OUT_DIMS[0]) and opa.shape == (N, OUT_DIMS[1])

    ref_c, ref_o = mlp_reference(sh0, opacity, gembedding, sembedding, (w1, b1, w2, b2, w3))
    np.testing.assert_allclose(np.asarray(color), np.asarray(ref_c), rtol=5e-2, atol=3e-2)
    np.testing.assert_allclose(np.asarray(opa), np.asarray(ref_o), rtol=5e-2, atol=3e-2)

    # Non-degenerate numerics check: same kernel with a random (non-zero) last layer.
    w3_rnd, _ = init_linear(k_l3, HIDDEN, sum(OUT_DIMS))
    kparams_rnd = prepare_params(w1, b1, w2, b2, w3_rnd)
    color_r, opa_r = color_opacity_mlp_forward(gembedding, sembedding, sh0, opacity, kparams_rnd)
    color_r, opa_r = jax.block_until_ready((color_r, opa_r))
    ref_cr, ref_or = mlp_reference(sh0, opacity, gembedding, sembedding, (w1, b1, w2, b2, w3_rnd))
    np.testing.assert_allclose(np.asarray(color_r), np.asarray(ref_cr), rtol=5e-2, atol=3e-2)
    np.testing.assert_allclose(np.asarray(opa_r), np.asarray(ref_or), rtol=5e-2, atol=3e-2)

    print("KERNEL_OK")
</pallas_src>

<mosaic_0001>
module attributes {stable_mosaic.version = 11 : i64} {
  func.func @mlp_kernel(%arg0: i32, %arg1: memref<512x3xbf16, #tpu.memory_space<vmem>>, %arg2: memref<512x1xbf16, #tpu.memory_space<vmem>>, %arg3: memref<512x16xbf16, #tpu.memory_space<vmem>>, %arg4: memref<512x12xbf16, #tpu.memory_space<vmem>>, %arg5: memref<3x32xbf16, #tpu.memory_space<vmem>>, %arg6: memref<1x32xbf16, #tpu.memory_space<vmem>>, %arg7: memref<16x32xbf16, #tpu.memory_space<vmem>>, %arg8: memref<12x32xbf16, #tpu.memory_space<vmem>>, %arg9: memref<1x32xf32, #tpu.memory_space<vmem>>, %arg10: memref<32x32xbf16, #tpu.memory_space<vmem>>, %arg11: memref<1x32xf32, #tpu.memory_space<vmem>>, %arg12: memref<32x3xbf16, #tpu.memory_space<vmem>>, %arg13: memref<32x1xbf16, #tpu.memory_space<vmem>>, %arg14: memref<512x3xf32, #tpu.memory_space<vmem>>, %arg15: memref<512x1xf32, #tpu.memory_space<vmem>>) attributes {dimension_semantics = [#tpu.dimension_semantics<parallel>], iteration_bounds = array<i64: 2>, scalar_prefetch = 0 : i64, scratch_operands = 0 : i64, tpu.core_type = #tpu.core_type<tc>, window_params = [{transform_indices = @transform_0, window_bounds = array<i64: 512, 3>}, {transform_indices = @transform_1, window_bounds = array<i64: 512, 1>}, {transform_indices = @transform_2, window_bounds = array<i64: 512, 16>}, {transform_indices = @transform_3, window_bounds = array<i64: 512, 12>}, {pipeline_mode = #tpu.pipeline_mode<synchronous>, transform_indices = @transform_4, window_bounds = array<i64: 3, 32>}, {pipeline_mode = #tpu.pipeline_mode<synchronous>, transform_indices = @transform_5, window_bounds = array<i64: 1, 32>}, {pipeline_mode = #tpu.pipeline_mode<synchronous>, transform_indices = @transform_6, window_bounds = array<i64: 16, 32>}, {pipeline_mode = #tpu.pipeline_mode<synchronous>, transform_indices = @transform_7, window_bounds = array<i64: 12, 32>}, {pipeline_mode = #tpu.pipeline_mode<synchronous>, transform_indices = @transform_8, window_bounds = array<i64: 1, 32>}, {pipeline_mode = #tpu.pipeline_mode<synchronous>, transform_indices = @transform_9, window_bounds = array<i64: 32, 32>}, {pipeline_mode = #tpu.pipeline_mode<synchronous>, transform_indices = @transform_10, window_bounds = array<i64: 1, 32>}, {pipeline_mode = #tpu.pipeline_mode<synchronous>, transform_indices = @transform_11, window_bounds = array<i64: 32, 3>}, {pipeline_mode = #tpu.pipeline_mode<synchronous>, transform_indices = @transform_12, window_bounds = array<i64: 32, 1>}, {transform_indices = @transform_13, window_bounds = array<i64: 512, 3>}, {transform_indices = @transform_14, window_bounds = array<i64: 512, 1>}]} {
    %c0 = arith.constant 0 : index
    %c0_0 = arith.constant 0 : index
    %0 = vector.load %arg1[%c0, %c0_0] : memref<512x3xbf16, #tpu.memory_space<vmem>>, vector<512x3xbf16>
    %c0_1 = arith.constant 0 : index
    %c0_2 = arith.constant 0 : index
    %1 = vector.load %arg5[%c0_1, %c0_2] : memref<3x32xbf16, #tpu.memory_space<vmem>>, vector<3x32xbf16>
    %cst = arith.constant dense<0.000000e+00> : vector<512x32xf32>
    %2 = tpu.matmul %0, %1, %cst {dimension_numbers = #tpu.dot_dimension_numbers<[1], [0], [0], [1], [0, 0, 1, 1], [], []>} : vector<512x3xbf16>, vector<3x32xbf16>, vector<512x32xf32> -> vector<512x32xf32>
    %c0_3 = arith.constant 0 : index
    %c0_4 = arith.constant 0 : index
    %3 = vector.load %arg3[%c0_3, %c0_4] : memref<512x16xbf16, #tpu.memory_space<vmem>>, vector<512x16xbf16>
    %c0_5 = arith.constant 0 : index
    %c0_6 = arith.constant 0 : index
    %4 = vector.load %arg7[%c0_5, %c0_6] : memref<16x32xbf16, #tpu.memory_space<vmem>>, vector<16x32xbf16>
    %cst_7 = arith.constant dense<0.000000e+00> : vector<512x32xf32>
    %5 = tpu.matmul %3, %4, %cst_7 {dimension_numbers = #tpu.dot_dimension_numbers<[1], [0], [0], [1], [0, 0, 1, 1], [], []>} : vector<512x16xbf16>, vector<16x32xbf16>, vector<512x32xf32> -> vector<512x32xf32>
    %6 = arith.addf %2, %5 : vector<512x32xf32>
    %c0_8 = arith.constant 0 : index
    %c0_9 = arith.constant 0 : index
    %7 = vector.load %arg4[%c0_8, %c0_9] : memref<512x12xbf16, #tpu.memory_space<vmem>>, vector<512x12xbf16>
    %c0_10 = arith.constant 0 : index
    %c0_11 = arith.constant 0 : index
    %8 = vector.load %arg8[%c0_10, %c0_11] : memref<12x32xbf16, #tpu.memory_space<vmem>>, vector<12x32xbf16>
    %cst_12 = arith.constant dense<0.000000e+00> : vector<512x32xf32>
    %9 = tpu.matmul %7, %8, %cst_12 {dimension_numbers = #tpu.dot_dimension_numbers<[1], [0], [0], [1], [0, 0, 1, 1], [], []>} : vector<512x12xbf16>, vector<12x32xbf16>, vector<512x32xf32> -> vector<512x32xf32>
    %10 = arith.addf %6, %9 : vector<512x32xf32>
    %c0_13 = arith.constant 0 : index
    %c0_14 = arith.constant 0 : index
    %11 = vector.load %arg2[%c0_13, %c0_14] : memref<512x1xbf16, #tpu.memory_space<vmem>>, vector<512x1xbf16>
    %12 = arith.extf %11 : vector<512x1xbf16> to vector<512x1xf32>
    %c0_15 = arith.constant 0 : index
    %c0_16 = arith.constant 0 : index
    %13 = vector.load %arg6[%c0_15, %c0_16] : memref<1x32xbf16, #tpu.memory_space<vmem>>, vector<1x32xbf16>
    %14 = arith.extf %13 : vector<1x32xbf16> to vector<1x32xf32>
    %15 = vector.broadcast %12 : vector<512x1xf32> to vector<512x32xf32>
    %16 = vector.broadcast %14 : vector<1x32xf32> to vector<512x32xf32>
    %17 = arith.mulf %15, %16 : vector<512x32xf32>
    %18 = arith.addf %10, %17 : vector<512x32xf32>
    %c0_17 = arith.constant 0 : index
    %c0_18 = arith.constant 0 : index
    %19 = vector.load %arg9[%c0_17, %c0_18] : memref<1x32xf32, #tpu.memory_space<vmem>>, vector<1x32xf32>
    %20 = vector.broadcast %19 : vector<1x32xf32> to vector<512x32xf32>
    %21 = arith.addf %18, %20 : vector<512x32xf32>
    %cst_19 = arith.constant 0.000000e+00 : f32
    %22 = vector.broadcast %cst_19 : f32 to vector<512x32xf32>
    %23 = arith.maximumf %21, %22 : vector<512x32xf32>
    %24 = arith.truncf %23 : vector<512x32xf32> to vector<512x32xbf16>
    %c0_20 = arith.constant 0 : index
    %c0_21 = arith.constant 0 : index
    %25 = vector.load %arg10[%c0_20, %c0_21] : memref<32x32xbf16, #tpu.memory_space<vmem>>, vector<32x32xbf16>
    %cst_22 = arith.constant dense<0.000000e+00> : vector<512x32xf32>
    %26 = tpu.matmul %24, %25, %cst_22 {dimension_numbers = #tpu.dot_dimension_numbers<[1], [0], [0], [1], [0, 0, 1, 1], [], []>} : vector<512x32xbf16>, vector<32x32xbf16>, vector<512x32xf32> -> vector<512x32xf32>
    %c0_23 = arith.constant 0 : index
    %c0_24 = arith.constant 0 : index
    %27 = vector.load %arg11[%c0_23, %c0_24] : memref<1x32xf32, #tpu.memory_space<vmem>>, vector<1x32xf32>
    %28 = vector.broadcast %27 : vector<1x32xf32> to vector<512x32xf32>
    %29 = arith.addf %26, %28 : vector<512x32xf32>
    %cst_25 = arith.constant 0.000000e+00 : f32
    %30 = vector.broadcast %cst_25 : f32 to vector<512x32xf32>
    %31 = arith.maximumf %29, %30 : vector<512x32xf32>
    %32 = arith.truncf %31 : vector<512x32xf32> to vector<512x32xbf16>
    %c0_26 = arith.constant 0 : index
    %c0_27 = arith.constant 0 : index
    %33 = vector.load %arg12[%c0_26, %c0_27] : memref<32x3xbf16, #tpu.memory_space<vmem>>, vector<32x3xbf16>
    %cst_28 = arith.constant dense<0.000000e+00> : vector<512x3xf32>
    %34 = tpu.matmul %32, %33, %cst_28 {dimension_numbers = #tpu.dot_dimension_numbers<[1], [0], [0], [1], [0, 0, 1, 1], [], []>} : vector<512x32xbf16>, vector<32x3xbf16>, vector<512x3xf32> -> vector<512x3xf32>
    %c0_29 = arith.constant 0 : index
    %c0_30 = arith.constant 0 : index
    %35 = vector.load %arg14[%c0_29, %c0_30] : memref<512x3xf32, #tpu.memory_space<vmem>>, vector<512x3xf32>
    tpu.vector_store %arg14[%c0_29, %c0_30], %34 {strides = array<i32>} : memref<512x3xf32, #tpu.memory_space<vmem>>, vector<512x3xf32>,
    %c0_31 = arith.constant 0 : index
    %c0_32 = arith.constant 0 : index
    %36 = vector.load %arg13[%c0_31, %c0_32] : memref<32x1xbf16, #tpu.memory_space<vmem>>, vector<32x1xbf16>
    %cst_33 = arith.constant dense<0.000000e+00> : vector<512x1xf32>
    %37 = tpu.matmul %32, %36, %cst_33 {dimension_numbers = #tpu.dot_dimension_numbers<[1], [0], [0], [1], [0, 0, 1, 1], [], []>} : vector<512x32xbf16>, vector<32x1xbf16>, vector<512x1xf32> -> vector<512x1xf32>
    %c0_34 = arith.constant 0 : index
    %c0_35 = arith.constant 0 : index
    %38 = vector.load %arg15[%c0_34, %c0_35] : memref<512x1xf32, #tpu.memory_space<vmem>>, vector<512x1xf32>
    tpu.vector_store %arg15[%c0_34, %c0_35], %37 {strides = array<i32>} : memref<512x1xf32, #tpu.memory_space<vmem>>, vector<512x1xf32>,
    return
  }
  func.func @transform_0(%arg0: i32) -> (i32, i32) {
    %c0_i32 = arith.constant 0 : i32
    %c0_i32_0 = arith.constant 0 : i32
    return %arg0, %c0_i32 : i32, i32
  }
  func.func @transform_1(%arg0: i32) -> (i32, i32) {
    %c0_i32 = arith.constant 0 : i32
    %c0_i32_0 = arith.constant 0 : i32
    return %arg0, %c0_i32 : i32, i32
  }
  func.func @transform_2(%arg0: i32) -> (i32, i32) {
    %c0_i32 = arith.constant 0 : i32
    %c0_i32_0 = arith.constant 0 : i32
    return %arg0, %c0_i32 : i32, i32
  }
  func.func @transform_3(%arg0: i32) -> (i32, i32) {
    %c0_i32 = arith.constant 0 : i32
    %c0_i32_0 = arith.constant 0 : i32
    return %arg0, %c0_i32 : i32, i32
  }
  func.func @transform_4(%arg0: i32) -> (i32, i32) {
    %c0_i32 = arith.constant 0 : i32
    %c0_i32_0 = arith.constant 0 : i32
    %c0_i32_1 = arith.constant 0 : i32
    return %c0_i32, %c0_i32_0 : i32, i32
  }
  func.func @transform_5(%arg0: i32) -> (i32, i32) {
    %c0_i32 = arith.constant 0 : i32
    %c0_i32_0 = arith.constant 0 : i32
    %c0_i32_1 = arith.constant 0 : i32
    return %c0_i32, %c0_i32_0 : i32, i32
  }
  func.func @transform_6(%arg0: i32) -> (i32, i32) {
    %c0_i32 = arith.constant 0 : i32
    %c0_i32_0 = arith.constant 0 : i32
    %c0_i32_1 = arith.constant 0 : i32
    return %c0_i32, %c0_i32_0 : i32, i32
  }
  func.func @transform_7(%arg0: i32) -> (i32, i32) {
    %c0_i32 = arith.constant 0 : i32
    %c0_i32_0 = arith.constant 0 : i32
    %c0_i32_1 = arith.constant 0 : i32
    return %c0_i32, %c0_i32_0 : i32, i32
  }
  func.func @transform_8(%arg0: i32) -> (i32, i32) {
    %c0_i32 = arith.constant 0 : i32
    %c0_i32_0 = arith.constant 0 : i32
    %c0_i32_1 = arith.constant 0 : i32
    return %c0_i32, %c0_i32_0 : i32, i32
  }
  func.func @transform_9(%arg0: i32) -> (i32, i32) {
    %c0_i32 = arith.constant 0 : i32
    %c0_i32_0 = arith.constant 0 : i32
    %c0_i32_1 = arith.constant 0 : i32
    return %c0_i32, %c0_i32_0 : i32, i32
  }
  func.func @transform_10(%arg0: i32) -> (i32, i32) {
    %c0_i32 = arith.constant 0 : i32
    %c0_i32_0 = arith.constant 0 : i32
    %c0_i32_1 = arith.constant 0 : i32
    return %c0_i32, %c0_i32_0 : i32, i32
  }
  func.func @transform_11(%arg0: i32) -> (i32, i32) {
    %c0_i32 = arith.constant 0 : i32
    %c0_i32_0 = arith.constant 0 : i32
    %c0_i32_1 = arith.constant 0 : i32
    return %c0_i32, %c0_i32_0 : i32, i32
  }
  func.func @transform_12(%arg0: i32) -> (i32, i32) {
    %c0_i32 = arith.constant 0 : i32
    %c0_i32_0 = arith.constant 0 : i32
    %c0_i32_1 = arith.constant 0 : i32
    return %c0_i32, %c0_i32_0 : i32, i32
  }
  func.func @transform_13(%arg0: i32) -> (i32, i32) {
    %c0_i32 = arith.constant 0 : i32
    %c0_i32_0 = arith.constant 0 : i32
    return %arg0, %c0_i32 : i32, i32
  }
  func.func @transform_14(%arg0: i32) -> (i32, i32) {
    %c0_i32 = arith.constant 0 : i32
    %c0_i32_0 = arith.constant 0 : i32
    return %arg0, %c0_i32 : i32, i32
  }
}

</mosaic_0001>

<bundles_post_ra>
// kernel: tpu_custom_call.1
= control target key start
LH: loop header
LB: loop body
LE: loop exit
PB: predicated region body
PF: predicated region fallthrough
CT: control target
= control target key end

     0   :  { %s6257_s29 = smov 0   ;;  %s7261_s0 = inlined_call_operand.vmem [shape: bf16[1024,3], index: 0, kind: input, shape index: {}]   ;;  %s7262_s1 = inlined_call_operand.vmem [shape: bf16[1024,1], index: 1, kind: input, shape index: {}]   ;;  %s7263_s2 = inlined_call_operand.vmem [shape: bf16[1024,16], index: 2, kind: input, shape index: {}]   ;;  %s7264_s3 = inlined_call_operand.vmem [shape: bf16[1024,12], index: 3, kind: input, shape index: {}]   ;;  %s7265_s4 = inlined_call_operand.vmem [shape: bf16[3,32], index: 4, kind: input, shape index: {}]   ;;  %s7266_s5 = inlined_call_operand.vmem [shape: bf16[1,32], index: 5, kind: input, shape index: {}]   ;;  %s7267_s6 = inlined_call_operand.vmem [shape: bf16[16,32], index: 6, kind: input, shape index: {}]   ;;  %s7268_s7 = inlined_call_operand.vmem [shape: bf16[12,32], index: 7, kind: input, shape index: {}]   ;;  %s7269_s8 = inlined_call_operand.vmem [shape: f32[1,32], index: 8, kind: input, shape index: {}]   ;;  %s7270_s9 = inlined_call_operand.vmem [shape: bf16[32,32], index: 9, kind: input, shape index: {}]   ;;  %s7271_s10 = inlined_call_operand.vmem [shape: f32[1,32], index: 10, kind: input, shape index: {}]   ;;  %s7272_s11 = inlined_call_operand.vmem [shape: bf16[32,3], index: 11, kind: input, shape index: {}]   ;;  %s7273_s12 = inlined_call_operand.vmem [shape: bf16[32,1], index: 12, kind: input, shape index: {}]   ;;  %s7274_s13 = inlined_call_operand.vmem [shape: f32[1024,3], index: 13, kind: output, shape index: {0}]   ;;  %s7275_s14 = inlined_call_operand.vmem [shape: f32[1024,1], index: 14, kind: output, shape index: {1}]  }
   0x1 LB: > { %s4688_s30 = sadd.s32 4294967295, %s6178_s29   ;;  %p4692_p0 = scmp.ge.s32.totalorder %s6178_s29, 1  ;;  %s6178_s29 = sphi %s6257_s29, %s25_s29  }
   0x2   : > { %p449_p1 = scmp.lt.s32.totalorder %s6178_s29, 3 }
   0x4   : > { %p450_p2 = pnand %p4692_p0, %p449_p1 }
   0x5   : > { %v6068_v0 = vld [vmem:[%s7267_s6] sm:$0xff] (!%p450_p2)   ;;  %s4693_s17 = sshll.u32 (!%p450_p2), %s4688_s30, 6  ;;  %vm1492_vm0 = vcmask (!%p450_p2), 1040384   ;;  %vm1493_vm1 = vcmask (!%p450_p2), 1041408   ;;  %v6180_v2 = vmov (!%p450_p2), 65535   ;;  %vm849_vm2 = vcmask (!%p450_p2), 130048  }
   0x6   : > { %453 = sbr.rel (%p450_p2) target bundleno = 1184 (0x4a0), region = 72  ;;  %p516_p3 = scmp.lt.s32.totalorder (!%p450_p2), %s4693_s17, 127  ;;  %v616_v1 = vld [vmem:[%s7265_s4] sm:$0x3] (!%p450_p2)  ;;  %5365 = vmatprep.subr.bf16.mxu0 (!%p450_p2), %v6068_v0  ;;  %v1494_v3 = vsel (!%p450_p2), %vm1492_vm0, 4294967295, %v6180_v2  ;;  %vm2116_vm3 = vcmask (!%p450_p2), 1045504  }
   0x7   : > { %5366 = vmatpush3.bf16.msra.mxu0 (!%p450_p2), %v6068_v0  ;;  %v1495_v4 = vsel (!%p450_p2), %vm1493_vm1, %v1494_v3, 0  ;;  %v6102_v5 = vld [vmem:[%s7268_s7] sm:$0x3f] (!%p450_p2)   ;;  %vm1395_vm4 = vcmask (!%p450_p2), 23552   ;;  %v6181_v50 = vmov (!%p450_p2), 0   ;;  %vm2019_vm5 = vcmask (!%p450_p2), 97280  }
   0x8   : > { %v1497_v6 = vand.u32 (!%p450_p2), %v1495_v4, %v616_v1  ;;  %v6290_v10 = vsel (!%p450_p2), %vm2116_vm3, %v6102_v5, 0  ;;  %5906 = vset.pattern.permute.xlu0 (!%p450_p2), %v6181_v50  ;;  %5917 = vset.pattern.permute.xlu1 (!%p450_p2), %v6181_v50  ;;  %vm3245_vm6 = vcmask (!%p450_p2), 261120   ;;  %vm4497_vm7 = vcmask (!%p450_p2), 7168  }
   0xa   : > { %5431 = vmatprep.subr.bf16.mxu0 (!%p450_p2), %v1497_v6 }
   0xd   : > { %s7277_s17 = smov (!%p516_p3, %s4693_s17), 127 }
   0xe   : > { %s6277_s22 = sshll.u32 %s7277_s17, 2 }
   0xf   : > { %s6283_s25 = scalar_lea.vmem %s7263_s2, %s6277_s22  ;;  %s6310_s28 = scalar_lea.vmem %s7261_s0, %s6277_s22 }
  0x10   : > { %v6069_v7 = vld [vmem:[%s6283_s25] sm:$0xff]   ;;  %v6070_v8 = vld [vmem:[%s6283_s25 + $0x8] sm:$0xff]   ;;  %v6071_v9 = vld [vmem:[%s6283_s25 + $0x10] sm:$0xff]   ;;  %s6362_s16 = scalar_lea.vmem %s7264_s3, %s6277_s22  ;;  %s6380_s20 = scalar_lea.vmem %s7262_s1, %s6277_s22 }
  0x11   : > { %5367 = vmatprep.mubr.msk.bf16.mxu0 %vm849_vm2, %v6069_v7  ;;  %v6072_v11 = vld [vmem:[%s6283_s25 + $0x18] sm:$0xff]   ;;  %v6073_v12 = vld [vmem:[%s6283_s25 + $0x20] sm:$0xff]   ;;  %v6074_v13 = vld [vmem:[%s6283_s25 + $0x28] sm:$0xff]  }
  0x12   : > { %5368 = vmatmul.mubr.msk.bf16.vlgmr.msra.gmra.mrb[0].mxu0 %vm849_vm2, %v6070_v8  ;;  %v6075_v14 = vld [vmem:[%s6283_s25 + $0x30] sm:$0xff]   ;;  %v6076_v15 = vld [vmem:[%s6283_s25 + $0x38] sm:$0xff]   ;;  %v6077_v16 = vld [vmem:[%s6283_s25 + $0x40] sm:$0xff]  }
  0x13   : > { %5432 = vmatpush3.bf16.msra.mxu0 %v1497_v6  ;;  %5371 = vmatprep.mubr.msk.bf16.mxu0 %vm849_vm2, %v6071_v9  ;;  %v6078_v17 = vld [vmem:[%s6283_s25 + $0x48] sm:$0xff]   ;;  %v6079_v18 = vld [vmem:[%s6283_s25 + $0x50] sm:$0xff]   ;;  %v6080_v19 = vld [vmem:[%s6283_s25 + $0x58] sm:$0xff]  }
  0x14   : > { %5895 = vmatprep.subr.msk.bf16.mxu0 %vm2116_vm3, %v6102_v5  ;;  %v6081_v20 = vld [vmem:[%s6283_s25 + $0x60] sm:$0xff]   ;;  %v6082_v21 = vld [vmem:[%s6283_s25 + $0x68] sm:$0xff]   ;;  %v6083_v22 = vld [vmem:[%s6283_s25 + $0x70] sm:$0xff]  }
  0x15   : > { %v6084_v23 = vld [vmem:[%s6283_s25 + $0x78] sm:$0xff]   ;;  %v6085_v24 = vld [vmem:[%s6283_s25 + $0x80] sm:$0xff]   ;;  %v6086_v25 = vld [vmem:[%s6283_s25 + $0x88] sm:$0xff]  }
  0x16   : > { %v6087_v26 = vld [vmem:[%s6283_s25 + $0x90] sm:$0xff]   ;;  %v6088_v27 = vld [vmem:[%s6283_s25 + $0x98] sm:$0xff]   ;;  %v6089_v28 = vld [vmem:[%s6283_s25 + $0xa0] sm:$0xff]  }
  0x17   : > { %v6090_v29 = vld [vmem:[%s6283_s25 + $0xa8] sm:$0xff]   ;;  %v6091_v30 = vld [vmem:[%s6283_s25 + $0xb0] sm:$0xff]   ;;  %v6092_v31 = vld [vmem:[%s6283_s25 + $0xb8] sm:$0xff]  }
  0x18   : > { %v6093_v32 = vld [vmem:[%s6283_s25 + $0xc0] sm:$0xff]   ;;  %v6094_v33 = vld [vmem:[%s6283_s25 + $0xc8] sm:$0xff]   ;;  %v6095_v34 = vld [vmem:[%s6283_s25 + $0xd0] sm:$0xff]  }
  0x19   : > { %v6096_v35 = vld [vmem:[%s6283_s25 + $0xd8] sm:$0xff]   ;;  %v6097_v36 = vld [vmem:[%s6283_s25 + $0xe0] sm:$0xff]   ;;  %v6098_v37 = vld [vmem:[%s6283_s25 + $0xe8] sm:$0xff]  }
  0x1a   : > { %5372 = vmatmul.mubr.msk.bf16.gmra.mrb[4].mxu0 %vm849_vm2, %v6072_v11  ;;  %v6099_v38 = vld [vmem:[%s6283_s25 + $0xf0] sm:$0xff]   ;;  %v6100_v39 = vld [vmem:[%s6283_s25 + $0xf8] sm:$0xff]   ;;  %v6101_v40 = vld [vmem:[%s6310_s28] sm:$0xff]   ;;  %s4702_s25 = sshll.u32 %s7277_s17, 3 }
  0x1b   : > { %5375 = vmatprep.mubr.msk.bf16.mxu0 %vm849_vm2, %v6073_v12  ;;  %v6103_v41 = vld [vmem:[%s6310_s28 + $0x8] sm:$0xff]   ;;  %v6104_v42 = vld [vmem:[%s6310_s28 + $0x10] sm:$0xff]   ;;  %v6105_v43 = vld [vmem:[%s6310_s28 + $0x18] sm:$0xff]  }
  0x1c   : > { %v6106_v44 = vld [vmem:[%s6310_s28 + $0x20] sm:$0xff]   ;;  %v6107_v45 = vld [vmem:[%s6310_s28 + $0x28] sm:$0xff]   ;;  %v6108_v46 = vld [vmem:[%s6310_s28 + $0x30] sm:$0xff]  }
  0x1d   : > { %v5006_v47 = vld [vmem:[%s6380_s20] sm:$0xff]   ;;  %v5133_v51 = vld [vmem:[%s6380_s20 + $0x8] sm:$0xff]   ;;  %v6109_v55 = vld [vmem:[%s6310_s28 + $0x38] sm:$0xff]  }
  0x1e   : > { %v5007_v48 = vunpack.c.l.bf16 %v5006_v47  ;;  %v5008_v49 = vunpack.c.h.bf16 %v5006_v47  ;;  %v5011_v53 = vunpack.c.l.bf16 %v5133_v51  ;;  %v5012_v54 = vunpack.c.h.bf16 %v5133_v51  ;;  %v6110_v57 = vld [vmem:[%s6310_s28 + $0x40] sm:$0xff]   ;;  %v5134_v58 = vld [vmem:[%s6380_s20 + $0x10] sm:$0xff]   ;;  %v5135_v0 = vld [vmem:[%s6380_s20 + $0x18] sm:$0xff]  }
  0x1f   : > { %v5136_v59 = vld [vmem:[%s6380_s20 + $0x20] sm:$0xff]   ;;  %v5015_v60 = vunpack.c.l.bf16 %v5134_v58  ;;  %v5016_v61 = vunpack.c.h.bf16 %v5134_v58  ;;  %v5138_v1 = vld [vmem:[%s6380_s20 + $0x30] sm:$0xff]   ;;  %v5019_v4 = vunpack.c.l.bf16 %v5135_v0  ;;  %v5020_v5 = vunpack.c.h.bf16 %v5135_v0  ;;  %v6111_v8 = vld [vmem:[%s6310_s28 + $0x48] sm:$0xff]  }
  0x20   : > { %v5907_v52 = vpack.i.bf16 %v5008_v49, %v5007_v48  ;;  %v5912_v56 = vpack.i.bf16 %v5012_v54, %v5011_v53  ;;  %v5023_v62 = vunpack.c.l.bf16 %v5136_v59  ;;  %v5024_v63 = vunpack.c.h.bf16 %v5136_v59  ;;  %v5137_v12 = vld [vmem:[%s6380_s20 + $0x28] sm:$0xff]   ;;  %v5148_v49 = vld [vmem:[%s6380_s20 + $0x80] sm:$0xff]   ;;  %v5147_v54 = vld [vmem:[%s6380_s20 + $0x78] sm:$0xff]  }
  0x21   : > { %v5918_v2 = vpack.i.bf16 %v5016_v61, %v5015_v60  ;;  %v5031_v6 = vunpack.c.l.bf16 %v5138_v1  ;;  %v5032_v7 = vunpack.c.h.bf16 %v5138_v1  ;;  %v5923_v9 = vpack.i.bf16 %v5020_v5, %v5019_v4  ;;  %v5145_v48 = vld [vmem:[%s6380_s20 + $0x68] sm:$0xff]   ;;  %v6118_v0 = vld [vmem:[%s6310_s28 + $0x80] sm:$0xff]  }
  0x22   : > { %5376 = vmatmul.mubr.msk.bf16.gmra.mrb[8].mxu0 %vm849_vm2, %v6074_v13  ;;  %5908 = vperm.xlu0 %5906, %v5907_v52   ;;  %v5928_v3 = vpack.i.bf16 %v5024_v63, %v5023_v62  ;;  %v5140_v13 = vld [vmem:[%s6380_s20 + $0x40] sm:$0xff]   ;;  %v5059_v50 = vunpack.c.l.bf16 %v5145_v48  ;;  %v5060_v51 = vunpack.c.h.bf16 %v5145_v48  ;;  %v5071_v52 = vunpack.c.l.bf16 %v5148_v49  ;;  %v6117_v62 = vld [vmem:[%s6310_s28 + $0x78] sm:$0xff]  }
  0x23   : > { %5379 = vmatprep.mubr.msk.bf16.mxu0 %vm849_vm2, %v6075_v14  ;;  %5919 = vperm.xlu1 %5917, %v5918_v2   ;;  %v5938_v11 = vpack.i.bf16 %v5032_v7, %v5031_v6  ;;  %v5027_v14 = vunpack.c.l.bf16 %v5137_v12  ;;  %v5072_v53 = vunpack.c.h.bf16 %v5148_v49  ;;  %v5067_v58 = vunpack.c.l.bf16 %v5147_v54  ;;  %v5149_v2 = vld [vmem:[%s6380_s20 + $0x88] sm:$0xff]  }
  0x24   : > { %v5068_v59 = vunpack.c.h.bf16 %v5147_v54  ;;  %v5075_v4 = vunpack.c.l.bf16 %v5149_v2  ;;  %v5076_v5 = vunpack.c.h.bf16 %v5149_v2  ;;  %v6124_v54 = vld [vmem:[%s6310_s28 + $0xb0] sm:$0xff]   ;;  %v6127_v2 = vld [vmem:[%s6310_s28 + $0xc8] sm:$0xff]  }
  0x26   : > { %5913 = vperm.xlu0 %5906, %v5912_v56   ;;  %v5973_v56 = vpack.i.bf16 %v5060_v51, %v5059_v50  ;;  %v5983_v63 = vpack.i.bf16 %v5068_v59, %v5067_v58  ;;  %v5163_v59 = vld [vmem:[%s6380_s20 + $0xf8] sm:$0xff]  }
  0x27   : > { %5924 = vperm.xlu1 %5917, %v5923_v9   ;;  %v5154_v9 = vld [vmem:[%s6380_s20 + $0xb0] sm:$0xff]  }
  0x2a   : > { %5380 = vmatmul.mubr.msk.bf16.gmra.mrb[12].mxu0 %vm849_vm2, %v6076_v15  ;;  %5929 = vperm.xlu0 %5906, %v5928_v3   ;;  %v5028_v15 = vunpack.c.h.bf16 %v5137_v12  ;;  %v5152_v3 = vld [vmem:[%s6380_s20 + $0xa0] sm:$0xff]  }
  0x2b   : > { %5383 = vmatprep.mubr.msk.bf16.mxu0 %vm849_vm2, %v6077_v16  ;;  %v5039_v16 = vunpack.c.l.bf16 %v5140_v13  ;;  %v5087_v6 = vunpack.c.l.bf16 %v5152_v3  ;;  %v5088_v7 = vunpack.c.h.bf16 %v5152_v3  ;;  %v6128_v3 = vld [vmem:[%s6310_s28 + $0xd0] sm:$0xff]  }
  0x2e   : > { %5939 = vperm.xlu0 %5906, %v5938_v11   ;;  %v6008_v11 = vpack.i.bf16 %v5088_v7, %v5087_v6  ;;  %v6131_v6 = vld [vmem:[%s6310_s28 + $0xe8] sm:$0xff]   ;;  %v6132_v7 = vld [vmem:[%s6310_s28 + $0xf0] sm:$0xff]  }
  0x32   : > { %5384 = vmatmul.mubr.msk.bf16.gmra.mrb[16].mxu0 %vm849_vm2, %v6078_v17  ;;  %v5040_v17 = vunpack.c.h.bf16 %v5140_v13 }
  0x33   : > { %5387 = vmatprep.mubr.msk.bf16.mxu0 %vm849_vm2, %v6079_v18  ;;  %v5139_v18 = vld [vmem:[%s6380_s20 + $0x38] sm:$0xff]  }
  0x3a   : > { %5388 = vmatmul.mubr.msk.bf16.gmra.mrb[20].mxu0 %vm849_vm2, %v6080_v19  ;;  %v5142_v19 = vld [vmem:[%s6380_s20 + $0x50] sm:$0xff]  }
  0x3b   : > { %5391 = vmatprep.mubr.msk.bf16.mxu0 %vm849_vm2, %v6081_v20  ;;  %v5933_v20 = vpack.i.bf16 %v5028_v15, %v5027_v14  ;;  %v5095_v14 = vunpack.c.l.bf16 %v5154_v9  ;;  %v5096_v15 = vunpack.c.h.bf16 %v5154_v9  ;;  %v6134_v9 = vld [vmem:[%s6362_s16] sm:$0xff]  }
  0x3d   : > { %5934 = vperm.xlu1 %5917, %v5933_v20   ;;  %v5153_v20 = vld [vmem:[%s6380_s20 + $0xa8] sm:$0xff]  }
  0x42   : > { %5392 = vmatmul.mubr.msk.bf16.gmra.mrb[24].mxu0 %vm849_vm2, %v6082_v21  ;;  %v5948_v21 = vpack.i.bf16 %v5040_v17, %v5039_v16  ;;  %v6119_v16 = vld [vmem:[%s6310_s28 + $0x88] sm:$0xff]  }
  0x43   : > { %5395 = vmatprep.mubr.msk.bf16.mxu0 %vm849_vm2, %v6083_v22  ;;  %v5035_v22 = vunpack.c.l.bf16 %v5139_v18 }
  0x44   : > { %5949 = vperm.xlu0 %5906, %v5948_v21   ;;  %v5156_v21 = vld [vmem:[%s6380_s20 + $0xc0] sm:$0xff]  }
  0x4a   : > { %5396 = vmatmul.mubr.msk.bf16.gmra.mrb[28].mxu0 %vm849_vm2, %v6084_v23  ;;  %v5036_v23 = vunpack.c.h.bf16 %v5139_v18  ;;  %v6120_v18 = vld [vmem:[%s6310_s28 + $0x90] sm:$0xff]  }
  0x4b   : > { %5399 = vmatprep.mubr.msk.bf16.mxu0 %vm849_vm2, %v6085_v24  ;;  %v5047_v24 = vunpack.c.l.bf16 %v5142_v19 }
  0x52   : > { %5400 = vmatmul.mubr.msk.bf16.gmra.mrb[32].mxu0 %vm849_vm2, %v6086_v25  ;;  %v5048_v25 = vunpack.c.h.bf16 %v5142_v19  ;;  %v6018_v19 = vpack.i.bf16 %v5096_v15, %v5095_v14  ;;  %v6139_v14 = vld [vmem:[%s6362_s16 + $0x28] sm:$0xff]   ;;  %v6140_v15 = vld [vmem:[%s6362_s16 + $0x30] sm:$0xff]  }
  0x53   : > { %5403 = vmatprep.mubr.msk.bf16.mxu0 %vm849_vm2, %v6087_v26  ;;  %v6113_v26 = vld [vmem:[%s6310_s28 + $0x58] sm:$0xff]  }
  0x5a   : > { %5404 = vmatmul.mubr.msk.bf16.gmra.mrb[36].mxu0 %vm849_vm2, %v6088_v27  ;;  %v5943_v27 = vpack.i.bf16 %v5036_v23, %v5035_v22  ;;  %v5091_v22 = vunpack.c.l.bf16 %v5153_v20  ;;  %v5092_v23 = vunpack.c.h.bf16 %v5153_v20  ;;  %v6145_v20 = vld [vmem:[%s6362_s16 + $0x58] sm:$0xff]  }
  0x5b   : > { %5407 = vmatprep.mubr.msk.bf16.mxu0 %vm849_vm2, %v6089_v28  ;;  %v6114_v28 = vld [vmem:[%s6310_s28 + $0x60] sm:$0xff]  }
  0x5c   : > { %5944 = vperm.xlu1 %5917, %v5943_v27   ;;  %v5158_v27 = vld [vmem:[%s6380_s20 + $0xd0] sm:$0xff]  }
  0x62   : > { %5408 = vmatmul.mubr.msk.bf16.gmra.mrb[40].mxu0 %vm849_vm2, %v6090_v29  ;;  %v5958_v29 = vpack.i.bf16 %v5048_v25, %v5047_v24  ;;  %v5103_v24 = vunpack.c.l.bf16 %v5156_v21  ;;  %v5104_v25 = vunpack.c.h.bf16 %v5156_v21  ;;  %v6146_v21 = vld [vmem:[%s6362_s16 + $0x60] sm:$0xff]  }
  0x63   : > { %5411 = vmatprep.mubr.msk.bf16.mxu0 %vm849_vm2, %v6091_v30  ;;  %v5141_v30 = vld [vmem:[%s6380_s20 + $0x48] sm:$0xff]  }
  0x64   : > { %5959 = vperm.xlu0 %5906, %v5958_v29   ;;  %v6028_v29 = vpack.i.bf16 %v5104_v25, %v5103_v24  ;;  %v6149_v24 = vld [vmem:[%s6362_s16 + $0x78] sm:$0xff]   ;;  %v6150_v25 = vld [vmem:[%s6362_s16 + $0x80] sm:$0xff]  }
  0x6a   : > { %5412 = vmatmul.mubr.msk.bf16.gmra.mrb[44].mxu0 %vm849_vm2, %v6092_v31  ;;  %v5144_v31 = vld [vmem:[%s6380_s20 + $0x60] sm:$0xff]  }
  0x6b   : > { %5415 = vmatprep.mubr.msk.bf16.mxu0 %vm849_vm2, %v6093_v32  ;;  %v5043_v32 = vunpack.c.l.bf16 %v5141_v30 }
  0x72   : > { %5416 = vmatmul.mubr.msk.bf16.gmra.mrb[48].mxu0 %vm849_vm2, %v6094_v33  ;;  %v5044_v33 = vunpack.c.h.bf16 %v5141_v30 }
  0x73   : > { %5419 = vmatprep.mubr.msk.bf16.mxu0 %vm849_vm2, %v6095_v34  ;;  %v5055_v34 = vunpack.c.l.bf16 %v5144_v31 }
  0x7a   : > { %5420 = vmatmul.mubr.msk.bf16.gmra.mrb[52].mxu0 %vm849_vm2, %v6096_v35  ;;  %v5056_v35 = vunpack.c.h.bf16 %v5144_v31 }
  0x7b   : > { %5423 = vmatprep.mubr.msk.bf16.mxu0 %vm849_vm2, %v6097_v36  ;;  %v5143_v36 = vld [vmem:[%s6380_s20 + $0x58] sm:$0xff]  }
  0x82   : > { %5424 = vmatmul.mubr.msk.bf16.gmra.mrb[56].mxu0 %vm849_vm2, %v6098_v37  ;;  %v5146_v37 = vld [vmem:[%s6380_s20 + $0x70] sm:$0xff]  }
  0x83   : > { %5427 = vmatprep.mubr.msk.bf16.mxu0 %vm849_vm2, %v6099_v38  ;;  %v5953_v38 = vpack.i.bf16 %v5044_v33, %v5043_v32  ;;  %v5111_v32 = vunpack.c.l.bf16 %v5158_v27  ;;  %v5112_v33 = vunpack.c.h.bf16 %v5158_v27  ;;  %v6152_v27 = vld [vmem:[%s6362_s16 + $0x90] sm:$0xff]  }
  0x85   : > { %5954 = vperm.xlu1 %5917, %v5953_v38   ;;  %v5157_v38 = vld [vmem:[%s6380_s20 + $0xc8] sm:$0xff]  }
  0x8a   : > { %5428 = vmatmul.mubr.msk.bf16.gmra.mrb[60].mxu0 %vm849_vm2, %v6100_v39  ;;  %v5968_v39 = vpack.i.bf16 %v5056_v35, %v5055_v34  ;;  %v6121_v34 = vld [vmem:[%s6310_s28 + $0x98] sm:$0xff]  }
  0x8b   : > { %5433 = vmatprep.mubr.msk.bf16.mxu0 %vm1395_vm4, %v6101_v40  ;;  %v5051_v40 = vunpack.c.l.bf16 %v5143_v36 }
  0x8c   : > { %5969 = vperm.xlu0 %5906, %v5968_v39   ;;  %v5160_v39 = vld [vmem:[%s6380_s20 + $0xe0] sm:$0xff]  }
  0x92   : > { %5434 = vmatmul.mubr.msk.bf16.vlgmr.msra.gmra.mrb[0].mxu0 %vm1395_vm4, %v6103_v41  ;;  %v5052_v41 = vunpack.c.h.bf16 %v5143_v36  ;;  %v6122_v36 = vld [vmem:[%s6310_s28 + $0xa0] sm:$0xff]  }
  0x93   : > { %5498 = vmatpush3.bf16.msra.mxu0 %v6290_v10  ;;  %5437 = vmatprep.mubr.msk.bf16.mxu0 %vm1395_vm4, %v6104_v42  ;;  %v6112_v10 = vld [vmem:[%s6310_s28 + $0x50] sm:$0xff]   ;;  %v5063_v42 = vunpack.c.l.bf16 %v5146_v37 }
  0x9a   : > { %5438 = vmatmul.mubr.msk.bf16.gmra.mrb[4].mxu0 %vm1395_vm4, %v6105_v43  ;;  %v5064_v43 = vunpack.c.h.bf16 %v5146_v37  ;;  %v6038_v37 = vpack.i.bf16 %v5112_v33, %v5111_v32  ;;  %v6157_v32 = vld [vmem:[%s6362_s16 + $0xb8] sm:$0xff]   ;;  %v6158_v33 = vld [vmem:[%s6362_s16 + $0xc0] sm:$0xff]  }
  0x9b   : > { %5441 = vmatprep.mubr.msk.bf16.mxu0 %vm1395_vm4, %v6106_v44  ;;  %v6115_v44 = vld [vmem:[%s6310_s28 + $0x68] sm:$0xff]  }
  0x9c   : > { %v5978_v47 = vpack.i.bf16 %v5064_v43, %v5063_v42  ;;  %v5119_v42 = vunpack.c.l.bf16 %v5160_v39  ;;  %v5120_v43 = vunpack.c.h.bf16 %v5160_v39  ;;  %v6162_v39 = vld [vmem:[%s6362_s16 + $0xe0] sm:$0xff]  }
  0x9e   : > { %5979 = vperm.xlu0 %5906, %v5978_v47   ;;  %v6048_v47 = vpack.i.bf16 %v5120_v43, %v5119_v42  ;;  %v6165_v42 = vld [vmem:[%s6362_s16 + $0xf8] sm:$0xff]   ;;  %v2923_v43 = vlaneseq }
  0xa2   : > { %5442 = vmatmul.mubr.msk.bf16.gmra.mrb[8].mxu0 %vm1395_vm4, %v6107_v45  ;;  %v5963_v45 = vpack.i.bf16 %v5052_v41, %v5051_v40  ;;  %v5107_v40 = vunpack.c.l.bf16 %v5157_v38  ;;  %v5108_v41 = vunpack.c.h.bf16 %v5157_v38  ;;  %v6161_v38 = vld [vmem:[%s6362_s16 + $0xd8] sm:$0xff]  }
  0xa3   : > { %5445 = vmatprep.mubr.msk.bf16.mxu0 %vm1395_vm4, %v6108_v46  ;;  %v6116_v46 = vld [vmem:[%s6310_s28 + $0x70] sm:$0xff]  }
  0xa4   : > { %5964 = vperm.xlu1 %5917, %v5963_v45   ;;  %v5162_v45 = vld [vmem:[%s6380_s20 + $0xf0] sm:$0xff]  }
  0xa5   : > { %v5127_v50 = vunpack.c.l.bf16 %v5162_v45  ;;  %v5128_v51 = vunpack.c.h.bf16 %v5162_v45  ;;  %v6539_v45 = vld [vmem:[%s7272_s11] sm:$0xff]  }
  0xa8   : > { %5974 = vperm.xlu1 %5917, %v5973_v56   ;;  %v5161_v56 = vld [vmem:[%s6380_s20 + $0xe8] sm:$0xff]  }
  0xa9   : > { %v5124_v58 = vunpack.c.h.bf16 %v5161_v56 }
  0xaa   : > { %5446 = vmatmul.mubr.msk.bf16.gmra.mrb[12].mxu0 %vm1395_vm4, %v6109_v55  ;;  %v5150_v55 = vld [vmem:[%s6380_s20 + $0x90] sm:$0xff]  }
  0xab   : > { %5449 = vmatprep.mubr.msk.bf16.mxu0 %vm1395_vm4, %v6110_v57  ;;  %v5988_v57 = vpack.i.bf16 %v5072_v53, %v5071_v52  ;;  %v5079_v60 = vunpack.c.l.bf16 %v5150_v55  ;;  %v5080_v61 = vunpack.c.h.bf16 %v5150_v55  ;;  %v6123_v52 = vld [vmem:[%s6310_s28 + $0xa8] sm:$0xff]   ;;  %v6058_v55 = vpack.i.bf16 %v5128_v51, %v5127_v50 }
  0xac   : > { %5984 = vperm.xlu1 %5917, %v5983_v63   ;;  %v6125_v63 = vld [vmem:[%s6310_s28 + $0xb8] sm:$0xff]  }
  0xad   : > { %5989 = vperm.xlu0 %5906, %v5988_v57   ;;  %v5998_v1 = vpack.i.bf16 %v5080_v61, %v5079_v60  ;;  %v5123_v57 = vunpack.c.l.bf16 %v5161_v56  ;;  %v5131_v61 = vunpack.c.l.bf16 %v5163_v59 }
  0xaf   : > { %v6053_v60 = vpack.i.bf16 %v5124_v58, %v5123_v57 }
  0xb1   : > { %5999 = vperm.xlu0 %5906, %v5998_v1   ;;  %v6126_v1 = vld [vmem:[%s6310_s28 + $0xc0] sm:$0xff]  }
  0xb2   : > { %5450 = vmatmul.mubr.msk.bf16.gmra.mrb[16].mxu0 %vm1395_vm4, %v6111_v8  ;;  %v5151_v8 = vld [vmem:[%s6380_s20 + $0x98] sm:$0xff]  }
  0xb3   : > { %5453 = vmatprep.mubr.msk.bf16.mxu0 %vm1395_vm4, %v6112_v10  ;;  %v5993_v10 = vpack.i.bf16 %v5076_v5, %v5075_v4  ;;  %v5083_v12 = vunpack.c.l.bf16 %v5151_v8  ;;  %v5084_v13 = vunpack.c.h.bf16 %v5151_v8  ;;  %v6129_v4 = vld [vmem:[%s6310_s28 + $0xd8] sm:$0xff]   ;;  %v6130_v5 = vld [vmem:[%s6310_s28 + $0xe0] sm:$0xff]  }
  0xb4   : > { %v6133_v8 = vld [vmem:[%s6310_s28 + $0xf8] sm:$0xff]   ;;  %s6975_s28 = scalar_lea.vmem %s7274_s13, %s4702_s25 }
  0xb5   : > { %5994 = vperm.xlu1 %5917, %v5993_v10   ;;  %v6003_v17 = vpack.i.bf16 %v5084_v13, %v5083_v12  ;;  %6009 = vperm.xlu0 %5906, %v6008_v11   ;;  %v6135_v10 = vld [vmem:[%s6362_s16 + $0x8] sm:$0xff]   ;;  %v6136_v11 = vld [vmem:[%s6362_s16 + $0x10] sm:$0xff]   ;;  %v6137_v12 = vld [vmem:[%s6362_s16 + $0x18] sm:$0xff]  }
  0xb6   : > { %v6138_v13 = vld [vmem:[%s6362_s16 + $0x20] sm:$0xff]  }
  0xb9   : > { %6004 = vperm.xlu1 %5917, %v6003_v17   ;;  %6019 = vperm.xlu0 %5906, %v6018_v19   ;;  %v6142_v17 = vld [vmem:[%s6362_s16 + $0x40] sm:$0xff]   ;;  %v6144_v19 = vld [vmem:[%s6362_s16 + $0x50] sm:$0xff]  }
  0xba   : > { %5454 = vmatmul.mubr.msk.bf16.gmra.mrb[20].mxu0 %vm1395_vm4, %v6113_v26  ;;  %v5155_v26 = vld [vmem:[%s6380_s20 + $0xb8] sm:$0xff]  }
  0xbb   : > { %5457 = vmatprep.mubr.msk.bf16.mxu0 %vm1395_vm4, %v6114_v28  ;;  %v6013_v28 = vpack.i.bf16 %v5092_v23, %v5091_v22  ;;  %v5099_v30 = vunpack.c.l.bf16 %v5155_v26  ;;  %v5100_v31 = vunpack.c.h.bf16 %v5155_v26  ;;  %v6147_v22 = vld [vmem:[%s6362_s16 + $0x68] sm:$0xff]   ;;  %v6148_v23 = vld [vmem:[%s6362_s16 + $0x70] sm:$0xff]  }
  0xbc   : > { %v6151_v26 = vld [vmem:[%s6362_s16 + $0x88] sm:$0xff]  }
  0xbd   : > { %6014 = vperm.xlu1 %5917, %v6013_v28   ;;  %v6023_v35 = vpack.i.bf16 %v5100_v31, %v5099_v30  ;;  %6029 = vperm.xlu0 %5906, %v6028_v29   ;;  %v6153_v28 = vld [vmem:[%s6362_s16 + $0x98] sm:$0xff]   ;;  %v6154_v29 = vld [vmem:[%s6362_s16 + $0xa0] sm:$0xff]   ;;  %v6155_v30 = vld [vmem:[%s6362_s16 + $0xa8] sm:$0xff]  }
  0xbe   : > { %v6156_v31 = vld [vmem:[%s6362_s16 + $0xb0] sm:$0xff]  }
  0xc1   : > { %6024 = vperm.xlu1 %5917, %v6023_v35   ;;  %6039 = vperm.xlu0 %5906, %v6038_v37   ;;  %v6167_v35 = vld [vmem:[%s7270_s9 + $0x8] sm:$0xff]   ;;  %v6160_v37 = vld [vmem:[%s6362_s16 + $0xd0] sm:$0xff]  }
  0xc2   : > { %5458 = vmatmul.mubr.msk.bf16.gmra.mrb[24].mxu0 %vm1395_vm4, %v6115_v44  ;;  %v5159_v44 = vld [vmem:[%s6380_s20 + $0xd8] sm:$0xff]  }
  0xc3   : > { %5461 = vmatprep.mubr.msk.bf16.mxu0 %vm1395_vm4, %v6116_v46  ;;  %v6033_v46 = vpack.i.bf16 %v5108_v41, %v5107_v40  ;;  %v5115_v48 = vunpack.c.l.bf16 %v5159_v44  ;;  %v5116_v49 = vunpack.c.h.bf16 %v5159_v44  ;;  %v6163_v40 = vld [vmem:[%s6362_s16 + $0xe8] sm:$0xff]   ;;  %v6164_v41 = vld [vmem:[%s6362_s16 + $0xf0] sm:$0xff]   ;;  %v2924_v44 = vshrl.u32 %v2923_v43, 7 }
  0xc5   : > { %6034 = vperm.xlu1 %5917, %v6033_v46   ;;  %v6043_v53 = vpack.i.bf16 %v5116_v49, %v5115_v48  ;;  %6049 = vperm.xlu0 %5906, %v6048_v47   ;;  %v5909_v46 = vpop.permute.xlu0 %5908  ;;  %v2601_v47 = vld [vmem:[%s7266_s5] sm:$0x1]  ;;  %v2925_v49 = vsub.s32 0, %v2924_v44 }
  0xc6   : > { %v2602_v48 = vunpack.c.l.bf16 %v2601_v47  ;;  %v5911_v57 = vunpack.i.h.bf16 %v5909_v46 }
  0xc9   : > { %6044 = vperm.xlu1 %5917, %v6043_v53   ;;  %6059 = vperm.xlu0 %5906, %v6058_v55   ;;  %v5914_v50 = vpop.permute.xlu0 %5913  ;;  %v5910_v53 = vunpack.i.l.bf16 %v5909_v46 }
  0xca   : > { %5462 = vmatmul.mubr.msk.bf16.gmra.mrb[28].mxu0 %vm1395_vm4, %v6117_v62  ;;  %v5132_v62 = vunpack.c.h.bf16 %v5163_v59  ;;  %v5915_v51 = vunpack.i.l.bf16 %v5914_v50  ;;  %v5916_v55 = vunpack.i.h.bf16 %v5914_v50 }
  0xcb   : > { %5465 = vmatprep.mubr.msk.bf16.mxu0 %vm1395_vm4, %v6118_v0 }
  0xcc   : > { %v6063_v0 = vpack.i.bf16 %v5132_v62, %v5131_v61  ;;  %v6552_v61 = vld [vmem:[%s7269_s8] ss:$0 sm:$0xff] }
  0xcd   : > { %6054 = vperm.xlu1 %5917, %v6053_v60  }
  0xd1   : > { %6064 = vperm.xlu1 %5917, %v6063_v0  }
  0xd2   : > { %5466 = vmatmul.mubr.msk.bf16.gmra.mrb[32].mxu0 %vm1395_vm4, %v6119_v16  ;;  %v6141_v16 = vld [vmem:[%s6362_s16 + $0x38] sm:$0xff]  }
  0xd3   : > { %5469 = vmatprep.mubr.msk.bf16.mxu0 %vm1395_vm4, %v6120_v18  ;;  %v6143_v18 = vld [vmem:[%s6362_s16 + $0x48] sm:$0xff]  }
  0xda   : > { %5470 = vmatmul.mubr.msk.bf16.gmra.mrb[36].mxu0 %vm1395_vm4, %v6121_v34  ;;  %v6166_v34 = vld [vmem:[%s7270_s9] sm:$0xff]  }
  0xdb   : > { %5473 = vmatprep.mubr.msk.bf16.mxu0 %vm1395_vm4, %v6122_v36  ;;  %5563 = vmatprep.subr.bf16.mxu1 %v6166_v34  ;;  %v6159_v36 = vld [vmem:[%s6362_s16 + $0xc8] sm:$0xff]   ;;  %s7128_s16 = scalar_lea.vmem %s7275_s14, %s4702_s25 }
  0xdc   : > { %5564 = vmatpush3.bf16.msra.mxu1 %v6166_v34 }
  0xdd   : > { %5565 = vmatprep.subr.bf16.mxu1 %v6167_v35 }
  0xe0   : > { %5566 = vmatpush3.bf16.msra.mxu1 %v6167_v35 }
  0xe1   : > { %5631 = vmatprep.subr.bf16.mxu1 %v6539_v45 }
  0xe2   : > { %5474 = vmatmul.mubr.msk.bf16.gmra.mrb[40].mxu0 %vm1395_vm4, %v6123_v52  ;;  %v6545_v52 = vrot.slane %v2602_v48, %v2925_v49 }
  0xe3   : > { %5477 = vmatprep.mubr.msk.bf16.mxu0 %vm1395_vm4, %v6124_v54  ;;  %v5920_v54 = vpop.permute.xlu1 %5919 }
  0xe4   : > { %v2929_v56 = vmul.f32 %v5915_v51, %v6545_v52  ;;  %v2927_v58 = vmul.f32 %v5910_v53, %v6545_v52 }
  0xe7   : > { %v5925_v59 = vpop.permute.xlu1 %5924 }
  0xe8   : > { %v5926_v62 = vunpack.i.l.bf16 %v5925_v59 }
  0xea   : > { %5478 = vmatmul.mubr.msk.bf16.gmra.mrb[44].mxu0 %vm1395_vm4, %v6125_v63 }
  0xeb   : > { %5481 = vmatprep.mubr.msk.bf16.mxu0 %vm1395_vm4, %v6126_v1  ;;  %v2930_v1 = vmul.f32 %v5916_v55, %v6545_v52 }
  0xf2   : > { %5482 = vmatmul.mubr.msk.bf16.gmra.mrb[48].mxu0 %vm1395_vm4, %v6127_v2  ;;  %v5921_v2 = vunpack.i.l.bf16 %v5920_v54 }
  0xf3   : > { %5485 = vmatprep.mubr.msk.bf16.mxu0 %vm1395_vm4, %v6128_v3 }
  0xfa   : > { %5486 = vmatmul.mubr.msk.bf16.gmra.mrb[52].mxu0 %vm1395_vm4, %v6129_v4 }
  0xfb   : > { %5489 = vmatprep.mubr.msk.bf16.mxu0 %vm1395_vm4, %v6130_v5  ;;  %v2928_v5 = vmul.f32 %v5911_v57, %v6545_v52 }
 0x102   : > { %5490 = vmatmul.mubr.msk.bf16.gmra.mrb[56].mxu0 %vm1395_vm4, %v6131_v6 }
 0x103   : > { %5493 = vmatprep.mubr.msk.bf16.mxu0 %vm1395_vm4, %v6132_v7 }
 0x10a   : > { %5494 = vmatmul.mubr.msk.bf16.gmra.mrb[60].mxu0 %vm1395_vm4, %v6133_v8 }
 0x10b   : > { %5499 = vmatprep.mubr.msk.bf16.mxu0 %vm2019_vm5, %v6134_v9 }
 0x112   : > { %5500 = vmatmul.mubr.msk.bf16.vlgmr.msra.gmra.mrb[0].mxu0 %vm2019_vm5, %v6135_v10 }
 0x113   : > { %5503 = vmatprep.mubr.msk.bf16.mxu0 %vm2019_vm5, %v6136_v11  ;;  %v5927_v11 = vunpack.i.h.bf16 %v5925_v59 }
 0x11a   : > { %5504 = vmatmul.mubr.msk.bf16.gmra.mrb[4].mxu0 %vm2019_vm5, %v6137_v12 }
 0x11b   : > { %5507 = vmatprep.mubr.msk.bf16.mxu0 %vm2019_vm5, %v6138_v13  ;;  %v2933_v13 = vmul.f32 %v5926_v62, %v6545_v52 }
 0x122   : > { %5508 = vmatmul.mubr.msk.bf16.gmra.mrb[8].mxu0 %vm2019_vm5, %v6139_v14  ;;  %v5922_v14 = vunpack.i.h.bf16 %v5920_v54 }
 0x123   : > { %5511 = vmatprep.mubr.msk.bf16.mxu0 %vm2019_vm5, %v6140_v15 }
 0x12a   : > { %5512 = vmatmul.mubr.msk.bf16.gmra.mrb[12].mxu0 %vm2019_vm5, %v6141_v16  ;;  %v2931_v16 = vmul.f32 %v5921_v2, %v6545_v52 }
 0x12b   : > { %5515 = vmatprep.mubr.msk.bf16.mxu0 %vm2019_vm5, %v6142_v17 }
 0x132   : > { %5516 = vmatmul.mubr.msk.bf16.gmra.mrb[16].mxu0 %vm2019_vm5, %v6143_v18 }
 0x133   : > { %5519 = vmatprep.mubr.msk.bf16.mxu0 %vm2019_vm5, %v6144_v19 }
 0x13a   : > { %5520 = vmatmul.mubr.msk.bf16.gmra.mrb[20].mxu0 %vm2019_vm5, %v6145_v20 }
 0x13b   : > { %5523 = vmatprep.mubr.msk.bf16.mxu0 %vm2019_vm5, %v6146_v21 }
 0x142   : > { %5524 = vmatmul.mubr.msk.bf16.gmra.mrb[24].mxu0 %vm2019_vm5, %v6147_v22 }
 0x143   : > { %5527 = vmatprep.mubr.msk.bf16.mxu0 %vm2019_vm5, %v6148_v23 }
 0x14a   : > { %5528 = vmatmul.mubr.msk.bf16.gmra.mrb[28].mxu0 %vm2019_vm5, %v6149_v24 }
 0x14b   : > { %5531 = vmatprep.mubr.msk.bf16.mxu0 %vm2019_vm5, %v6150_v25  ;;  %v2934_v25 = vmul.f32 %v5927_v11, %v6545_v52 }
 0x152   : > { %5532 = vmatmul.mubr.msk.bf16.gmra.mrb[32].mxu0 %vm2019_vm5, %v6151_v26  ;;  %v5935_v26 = vpop.permute.xlu1 %5934 }
 0x153   : > { %5535 = vmatprep.mubr.msk.bf16.mxu0 %vm2019_vm5, %v6152_v27 }
 0x156   : > { %v5945_v57 = vpop.permute.xlu1 %5944 }
 0x15a   : > { %5536 = vmatmul.mubr.msk.bf16.gmra.mrb[36].mxu0 %vm2019_vm5, %v6153_v28 }
 0x15b   : > { %5539 = vmatprep.mubr.msk.bf16.mxu0 %vm2019_vm5, %v6154_v29  ;;  %v2932_v29 = vmul.f32 %v5922_v14, %v6545_v52 }
 0x162   : > { %5540 = vmatmul.mubr.msk.bf16.gmra.mrb[40].mxu0 %vm2019_vm5, %v6155_v30 }
 0x163   : > { %5543 = vmatprep.mubr.msk.bf16.mxu0 %vm2019_vm5, %v6156_v31  ;;  %v5930_v31 = vpop.permute.xlu0 %5929 }
 0x167   : > { %v5940_v62 = vpop.permute.xlu0 %5939 }
 0x16a   : > { %5544 = vmatmul.mubr.msk.bf16.gmra.mrb[44].mxu0 %vm2019_vm5, %v6157_v32  ;;  %v5936_v32 = vunpack.i.l.bf16 %v5935_v26 }
 0x16b   : > { %5547 = vmatprep.mubr.msk.bf16.mxu0 %vm2019_vm5, %v6158_v33 }
 0x16c   : > { %v2937_v47 = vmul.f32 %v5936_v32, %v6545_v52 }
 0x172   : > { %5548 = vmatmul.mubr.msk.bf16.gmra.mrb[48].mxu0 %vm2019_vm5, %v6159_v36  ;;  %v6169_v36 = vld [vmem:[%s7272_s11 + $0x8] sm:$0xff]  }
 0x173   : > { %5551 = vmatprep.mubr.msk.bf16.mxu0 %vm2019_vm5, %v6160_v37  ;;  %v5931_v37 = vunpack.i.l.bf16 %v5930_v31 }
 0x175   : > { %v2935_v51 = vmul.f32 %v5931_v37, %v6545_v52 }
 0x17a   : > { %5552 = vmatmul.mubr.msk.bf16.gmra.mrb[52].mxu0 %vm2019_vm5, %v6161_v38 }
 0x17b   : > { %5555 = vmatprep.mubr.msk.bf16.mxu0 %vm2019_vm5, %v6162_v39 }
 0x182   : > { %5556 = vmatmul.mubr.msk.bf16.gmra.mrb[56].mxu0 %vm2019_vm5, %v6163_v40  ;;  %v5937_v40 = vunpack.i.h.bf16 %v5935_v26  ;;  %v5950_v26 = vpop.permute.xlu0 %5949 }
 0x183   : > { %5559 = vmatprep.mubr.msk.bf16.mxu0 %vm2019_vm5, %v6164_v41 }
 0x18a   : > { %5560 = vmatmul.mubr.msk.bf16.gmra.mrb[60].mxu0 %vm2019_vm5, %v6165_v42  ;;  %v5932_v42 = vunpack.i.h.bf16 %v5930_v31  ;;  %v5951_v31 = vunpack.i.l.bf16 %v5950_v26 }
 0x1e5   : > { %v5501_v60 = vpop.f32.mrb[0].mxu0 }
 0x1e6   : > { %v2993_v63 = vadd.f32 %v5501_v60, %v2929_v56  ;;  %v2154_v0 = vpop.f32.mrb[1].mxu0  ;;  %v2938_v56 = vmul.f32 %v5937_v40, %v6545_v52 }
 0x1e7   : > { %v2991_v3 = vadd.f32 %v2927_v58, %v2154_v0  ;;  %v5502_v4 = vpop.f32.mrb[2].mxu0 }
 0x1e8   : > { %v3064_v6 = vadd.f32 %v6552_v61, %v2993_v63  ;;  %v2994_v7 = vadd.f32 %v5502_v4, %v2930_v1  ;;  %v2157_v8 = vpop.f32.mrb[3].mxu0  ;;  %v5946_v63 = vunpack.i.l.bf16 %v5945_v57 }
 0x1e9   : > { %v3062_v9 = vadd.f32 %v6552_v61, %v2991_v3  ;;  %v2992_v10 = vadd.f32 %v2928_v5, %v2157_v8  ;;  %v5941_v3 = vunpack.i.l.bf16 %v5940_v62  ;;  %v5942_v8 = vunpack.i.h.bf16 %v5940_v62 }
 0x1ea   : > { %v3065_v12 = vadd.f32 %v6552_v61, %v2994_v7  ;;  %v3128_v17 = vmax.f32 %v3064_v6, 0.0  ;;  %v5947_v6 = vunpack.i.h.bf16 %v5945_v57 }
 0x1eb   : > { %v3063_v15 = vadd.f32 %v6552_v61, %v2992_v10  ;;  %v3126_v19 = vmax.f32 %v3062_v9, 0.0 }
 0x1ec   : > { %v3129_v18 = vmax.f32 %v3065_v12, 0.0  ;;  %v2941_v12 = vmul.f32 %v5946_v63, %v6545_v52 }
 0x1ed   : > { %v3127_v20 = vmax.f32 %v3063_v15, 0.0  ;;  %v5505_v21 = vpop.f32.mrb[4].mxu0 }
 0x1ee   : > { %v3191_v22 = vpack.c.bf16 %v3129_v18, %v3128_v17  ;;  %v2997_v23 = vadd.f32 %v5505_v21, %v2933_v13  ;;  %v2170_v24 = vpop.f32.mrb[5].mxu0  ;;  %v5955_v21 = vpop.permute.xlu1 %5954 }
 0x1ef   : > { %v2995_v27 = vadd.f32 %v2931_v16, %v2170_v24  ;;  %v5506_v28 = vpop.f32.mrb[6].mxu0  ;;  %v3190_v30 = vpack.c.bf16 %v3127_v20, %v3126_v19  ;;  %v2939_v16 = vmul.f32 %v5941_v3, %v6545_v52  ;;  %v2942_v20 = vmul.f32 %v5947_v6, %v6545_v52 }
 0x1f0   : > { %v3068_v33 = vadd.f32 %v6552_v61, %v2997_v23  ;;  %v2998_v34 = vadd.f32 %v5506_v28, %v2934_v25  ;;  %v2173_v35 = vpop.f32.mrb[7].mxu0  ;;  %v2940_v25 = vmul.f32 %v5942_v8, %v6545_v52 }
 0x1f1   : > { %v3066_v38 = vadd.f32 %v6552_v61, %v2995_v27  ;;  %v2996_v39 = vadd.f32 %v2932_v29, %v2173_v35  ;;  %5567 = vmatprep.mubr.msk.bf16.mxu1 %vm3245_vm6, %v3190_v30  ;;  %v5956_v27 = vunpack.i.l.bf16 %v5955_v21 }
 0x1f2   : > { %v3069_v41 = vadd.f32 %v6552_v61, %v2998_v34  ;;  %5568 = vmatmul.mubr.msk.bf16.vlgmr.msra.gmra.mrb[0].mxu1 %vm3245_vm6, %v3191_v22  ;;  %v3132_v44 = vmax.f32 %v3068_v33, 0.0  ;;  %v5957_v34 = vunpack.i.h.bf16 %v5955_v21 }
 0x1f3   : > { %v3067_v43 = vadd.f32 %v6552_v61, %v2996_v39  ;;  %5632 = vmatpush3.bf16.msra.mxu1 %v6539_v45  ;;  %v3130_v48 = vmax.f32 %v3066_v38, 0.0  ;;  %v2936_v45 = vmul.f32 %v5932_v42, %v6545_v52  ;;  %v2945_v40 = vmul.f32 %v5956_v27, %v6545_v52 }
 0x1f4   : > { %v3133_v46 = vmax.f32 %v3069_v41, 0.0  ;;  %5633 = vmatprep.subr.bf16.mxu1 %v6169_v36 }
 0x1f5   : > { %v3131_v49 = vmax.f32 %v3067_v43, 0.0  ;;  %v5509_v50 = vpop.f32.mrb[8].mxu0 }
 0x1f6   : > { %v3193_v53 = vpack.c.bf16 %v3133_v46, %v3132_v44  ;;  %v3001_v54 = vadd.f32 %v5509_v50, %v2937_v47  ;;  %v2186_v55 = vpop.f32.mrb[9].mxu0  ;;  %v2943_v44 = vmul.f32 %v5951_v31, %v6545_v52  ;;  %v5965_v50 = vpop.permute.xlu1 %5964 }
 0x1f7   : > { %v3192_v58 = vpack.c.bf16 %v3131_v49, %v3130_v48  ;;  %v2999_v59 = vadd.f32 %v2935_v51, %v2186_v55  ;;  %v5510_v60 = vpop.f32.mrb[10].mxu0  ;;  %5634 = vmatpush3.bf16.msra.mxu1 %v6169_v36  ;;  %v5952_v36 = vunpack.i.h.bf16 %v5950_v26  ;;  %v2946_v49 = vmul.f32 %v5957_v34, %v6545_v52 }
 0x1f8   : > { %v3072_v0 = vadd.f32 %v6552_v61, %v3001_v54  ;;  %v3002_v1 = vadd.f32 %v5510_v60, %v2938_v56  ;;  %v2189_v2 = vpop.f32.mrb[11].mxu0  ;;  %v5960_v56 = vpop.permute.xlu0 %5959  ;;  %v5966_v57 = vunpack.i.l.bf16 %v5965_v50 }
 0x1f9   : > { %v3070_v4 = vadd.f32 %v6552_v61, %v2999_v59  ;;  %v3000_v5 = vadd.f32 %v2936_v45, %v2189_v2  ;;  %5571 = vmatprep.mubr.msk.bf16.mxu1 %vm3245_vm6, %v3192_v58  ;;  %v2944_v55 = vmul.f32 %v5952_v36, %v6545_v52  ;;  %v5961_v45 = vunpack.i.l.bf16 %v5960_v56 }
 0x1fa   : > { %v3073_v7 = vadd.f32 %v6552_v61, %v3002_v1  ;;  %5572 = vmatmul.mubr.msk.bf16.gmra.mrb[4].mxu1 %vm3245_vm6, %v3193_v53  ;;  %v3136_v10 = vmax.f32 %v3072_v0, 0.0  ;;  %v5967_v0 = vunpack.i.h.bf16 %v5965_v50  ;;  %v5962_v2 = vunpack.i.h.bf16 %v5960_v56 }
 0x1fb   : > { %v3071_v9 = vadd.f32 %v6552_v61, %v3000_v5  ;;  %v3134_v13 = vmax.f32 %v3070_v4, 0.0  ;;  %v2949_v6 = vmul.f32 %v5966_v57, %v6545_v52 }
 0x1fc   : > { %v3137_v11 = vmax.f32 %v3073_v7, 0.0 }
 0x1fd   : > { %v3135_v14 = vmax.f32 %v3071_v9, 0.0  ;;  %v5513_v15 = vpop.f32.mrb[12].mxu0 }
 0x1fe   : > { %v3195_v17 = vpack.c.bf16 %v3137_v11, %v3136_v10  ;;  %v3005_v18 = vadd.f32 %v5513_v15, %v2941_v12  ;;  %v2202_v19 = vpop.f32.mrb[13].mxu0  ;;  %v2947_v10 = vmul.f32 %v5961_v45, %v6545_v52  ;;  %v5975_v15 = vpop.permute.xlu1 %5974 }
 0x1ff   : > { %v3194_v22 = vpack.c.bf16 %v3135_v14, %v3134_v13  ;;  %v3003_v23 = vadd.f32 %v2939_v16, %v2202_v19  ;;  %v5514_v24 = vpop.f32.mrb[14].mxu0  ;;  %v2950_v14 = vmul.f32 %v5967_v0, %v6545_v52  ;;  %v2948_v19 = vmul.f32 %v5962_v2, %v6545_v52 }
 0x200   : > { %v3076_v28 = vadd.f32 %v6552_v61, %v3005_v18  ;;  %v3006_v29 = vadd.f32 %v5514_v24, %v2942_v20  ;;  %v2205_v30 = vpop.f32.mrb[15].mxu0  ;;  %v5970_v20 = vpop.permute.xlu0 %5969  ;;  %v5976_v21 = vunpack.i.l.bf16 %v5975_v15 }
 0x201   : > { %v3074_v32 = vadd.f32 %v6552_v61, %v3003_v23  ;;  %v3004_v33 = vadd.f32 %v2940_v25, %v2205_v30  ;;  %5575 = vmatprep.mubr.msk.bf16.mxu1 %vm3245_vm6, %v3194_v22  ;;  %v5971_v25 = vunpack.i.l.bf16 %v5970_v20  ;;  %v5972_v30 = vunpack.i.h.bf16 %v5970_v20 }
 0x202   : > { %v3077_v35 = vadd.f32 %v6552_v61, %v3006_v29  ;;  %5576 = vmatmul.mubr.msk.bf16.gmra.mrb[8].mxu1 %vm3245_vm6, %v3195_v17  ;;  %v3140_v38 = vmax.f32 %v3076_v28, 0.0  ;;  %v5977_v28 = vunpack.i.h.bf16 %v5975_v15  ;;  %v2953_v34 = vmul.f32 %v5976_v21, %v6545_v52 }
 0x203   : > { %v3075_v37 = vadd.f32 %v6552_v61, %v3004_v33  ;;  %v3138_v41 = vmax.f32 %v3074_v32, 0.0 }
 0x204   : > { %v3141_v39 = vmax.f32 %v3077_v35, 0.0 }
 0x205   : > { %v3139_v42 = vmax.f32 %v3075_v37, 0.0  ;;  %v5517_v43 = vpop.f32.mrb[16].mxu0 }
 0x206   : > { %v3197_v46 = vpack.c.bf16 %v3141_v39, %v3140_v38  ;;  %v3009_v47 = vadd.f32 %v5517_v43, %v2945_v40  ;;  %v2218_v48 = vpop.f32.mrb[17].mxu0  ;;  %v2951_v38 = vmul.f32 %v5971_v25, %v6545_v52  ;;  %v5985_v43 = vpop.permute.xlu1 %5984 }
 0x207   : > { %v3196_v51 = vpack.c.bf16 %v3139_v42, %v3138_v41  ;;  %v3007_v53 = vadd.f32 %v2943_v44, %v2218_v48  ;;  %v5518_v54 = vpop.f32.mrb[18].mxu0  ;;  %v2954_v42 = vmul.f32 %v5977_v28, %v6545_v52  ;;  %v2952_v48 = vmul.f32 %v5972_v30, %v6545_v52 }
 0x208   : > { %v3080_v58 = vadd.f32 %v6552_v61, %v3009_v47  ;;  %v3010_v59 = vadd.f32 %v5518_v54, %v2946_v49  ;;  %v2221_v60 = vpop.f32.mrb[19].mxu0  ;;  %v5980_v49 = vpop.permute.xlu0 %5979  ;;  %v5986_v50 = vunpack.i.l.bf16 %v5985_v43 }
 0x209   : > { %v3078_v62 = vadd.f32 %v6552_v61, %v3007_v53  ;;  %v3008_v63 = vadd.f32 %v2944_v55, %v2221_v60  ;;  %5579 = vmatprep.mubr.msk.bf16.mxu1 %vm3245_vm6, %v3196_v51  ;;  %v5981_v55 = vunpack.i.l.bf16 %v5980_v49  ;;  %v5982_v60 = vunpack.i.h.bf16 %v5980_v49 }
 0x20a   : > { %v3081_v1 = vadd.f32 %v6552_v61, %v3010_v59  ;;  %5580 = vmatmul.mubr.msk.bf16.gmra.mrb[12].mxu1 %vm3245_vm6, %v3197_v46  ;;  %v3144_v4 = vmax.f32 %v3080_v58, 0.0  ;;  %v5987_v58 = vunpack.i.h.bf16 %v5985_v43  ;;  %v2957_v0 = vmul.f32 %v5986_v50, %v6545_v52 }
 0x20b   : > { %v3079_v3 = vadd.f32 %v6552_v61, %v3008_v63  ;;  %v3142_v7 = vmax.f32 %v3078_v62, 0.0 }
 0x20c   : > { %v3145_v5 = vmax.f32 %v3081_v1, 0.0 }
 0x20d   : > { %v3143_v8 = vmax.f32 %v3079_v3, 0.0  ;;  %v5521_v9 = vpop.f32.mrb[20].mxu0 }
 0x20e   : > { %v3199_v11 = vpack.c.bf16 %v3145_v5, %v3144_v4  ;;  %v3013_v12 = vadd.f32 %v5521_v9, %v2949_v6  ;;  %v2234_v13 = vpop.f32.mrb[21].mxu0  ;;  %v2955_v4 = vmul.f32 %v5981_v55, %v6545_v52  ;;  %v5995_v9 = vpop.permute.xlu1 %5994 }
 0x20f   : > { %v3198_v16 = vpack.c.bf16 %v3143_v8, %v3142_v7  ;;  %v3011_v17 = vadd.f32 %v2947_v10, %v2234_v13  ;;  %v5522_v18 = vpop.f32.mrb[22].mxu0  ;;  %v2958_v8 = vmul.f32 %v5987_v58, %v6545_v52  ;;  %v2956_v13 = vmul.f32 %v5982_v60, %v6545_v52 }
 0x210   : > { %v3084_v22 = vadd.f32 %v6552_v61, %v3013_v12  ;;  %v3014_v23 = vadd.f32 %v5522_v18, %v2950_v14  ;;  %v2237_v24 = vpop.f32.mrb[23].mxu0  ;;  %v5990_v14 = vpop.permute.xlu0 %5989  ;;  %v5996_v15 = vunpack.i.l.bf16 %v5995_v9 }
 0x211   : > { %v3082_v26 = vadd.f32 %v6552_v61, %v3011_v17  ;;  %v3012_v27 = vadd.f32 %v2948_v19, %v2237_v24  ;;  %5583 = vmatprep.mubr.msk.bf16.mxu1 %vm3245_vm6, %v3198_v16  ;;  %v5991_v19 = vunpack.i.l.bf16 %v5990_v14  ;;  %v5992_v24 = vunpack.i.h.bf16 %v5990_v14 }
 0x212   : > { %v3085_v29 = vadd.f32 %v6552_v61, %v3014_v23  ;;  %5584 = vmatmul.mubr.msk.bf16.gmra.mrb[16].mxu1 %vm3245_vm6, %v3199_v11  ;;  %v3148_v32 = vmax.f32 %v3084_v22, 0.0  ;;  %v5997_v22 = vunpack.i.h.bf16 %v5995_v9  ;;  %v2961_v28 = vmul.f32 %v5996_v15, %v6545_v52 }
 0x213   : > { %v3083_v31 = vadd.f32 %v6552_v61, %v3012_v27  ;;  %v3146_v35 = vmax.f32 %v3082_v26, 0.0 }
 0x214   : > { %v3149_v33 = vmax.f32 %v3085_v29, 0.0 }
 0x215   : > { %v3147_v36 = vmax.f32 %v3083_v31, 0.0  ;;  %v5525_v37 = vpop.f32.mrb[24].mxu0 }
 0x216   : > { %v3201_v39 = vpack.c.bf16 %v3149_v33, %v3148_v32  ;;  %v3017_v40 = vadd.f32 %v5525_v37, %v2953_v34  ;;  %v2250_v41 = vpop.f32.mrb[25].mxu0  ;;  %v2959_v32 = vmul.f32 %v5991_v19, %v6545_v52  ;;  %v6005_v37 = vpop.permute.xlu1 %6004 }
 0x217   : > { %v3200_v44 = vpack.c.bf16 %v3147_v36, %v3146_v35  ;;  %v3015_v46 = vadd.f32 %v2951_v38, %v2250_v41  ;;  %v5526_v47 = vpop.f32.mrb[26].mxu0  ;;  %v2962_v36 = vmul.f32 %v5997_v22, %v6545_v52  ;;  %v2960_v41 = vmul.f32 %v5992_v24, %v6545_v52 }
 0x218   : > { %v3088_v51 = vadd.f32 %v6552_v61, %v3017_v40  ;;  %v3018_v53 = vadd.f32 %v5526_v47, %v2954_v42  ;;  %v2253_v54 = vpop.f32.mrb[27].mxu0  ;;  %v6000_v42 = vpop.permute.xlu0 %5999  ;;  %v6006_v43 = vunpack.i.l.bf16 %v6005_v37 }
 0x219   : > { %v3086_v56 = vadd.f32 %v6552_v61, %v3015_v46  ;;  %v3016_v57 = vadd.f32 %v2952_v48, %v2253_v54  ;;  %5587 = vmatprep.mubr.msk.bf16.mxu1 %vm3245_vm6, %v3200_v44  ;;  %v6001_v48 = vunpack.i.l.bf16 %v6000_v42  ;;  %v6002_v54 = vunpack.i.h.bf16 %v6000_v42 }
 0x21a   : > { %v3089_v59 = vadd.f32 %v6552_v61, %v3018_v53  ;;  %5588 = vmatmul.mubr.msk.bf16.gmra.mrb[20].mxu1 %vm3245_vm6, %v3201_v39  ;;  %v3152_v62 = vmax.f32 %v3088_v51, 0.0  ;;  %v6007_v51 = vunpack.i.h.bf16 %v6005_v37  ;;  %v2965_v58 = vmul.f32 %v6006_v43, %v6545_v52 }
 0x21b   : > { %v3087_v45 = vadd.f32 %v6552_v61, %v3016_v57  ;;  %v3150_v1 = vmax.f32 %v3086_v56, 0.0 }
 0x21c   : > { %v3153_v63 = vmax.f32 %v3089_v59, 0.0 }
 0x21d   : > { %v3151_v2 = vmax.f32 %v3087_v45, 0.0  ;;  %v5529_v3 = vpop.f32.mrb[28].mxu0 }
 0x21e   : > { %v3203_v5 = vpack.c.bf16 %v3153_v63, %v3152_v62  ;;  %v3021_v6 = vadd.f32 %v5529_v3, %v2957_v0  ;;  %v2266_v7 = vpop.f32.mrb[29].mxu0  ;;  %v2963_v62 = vmul.f32 %v6001_v48, %v6545_v52  ;;  %v6015_v3 = vpop.permute.xlu1 %6014 }
 0x21f   : > { %v3202_v10 = vpack.c.bf16 %v3151_v2, %v3150_v1  ;;  %v3019_v11 = vadd.f32 %v2955_v4, %v2266_v7  ;;  %v5530_v12 = vpop.f32.mrb[30].mxu0  ;;  %v2966_v2 = vmul.f32 %v6007_v51, %v6545_v52  ;;  %v2964_v7 = vmul.f32 %v6002_v54, %v6545_v52 }
 0x220   : > { %v3092_v16 = vadd.f32 %v6552_v61, %v3021_v6  ;;  %v3022_v17 = vadd.f32 %v5530_v12, %v2958_v8  ;;  %v2269_v18 = vpop.f32.mrb[31].mxu0  ;;  %v6010_v8 = vpop.permute.xlu0 %6009  ;;  %v6016_v9 = vunpack.i.l.bf16 %v6015_v3 }
 0x221   : > { %v3090_v20 = vadd.f32 %v6552_v61, %v3019_v11  ;;  %v3020_v21 = vadd.f32 %v2956_v13, %v2269_v18  ;;  %5591 = vmatprep.mubr.msk.bf16.mxu1 %vm3245_vm6, %v3202_v10  ;;  %v6011_v13 = vunpack.i.l.bf16 %v6010_v8  ;;  %v6012_v18 = vunpack.i.h.bf16 %v6010_v8 }
 0x222   : > { %v3093_v23 = vadd.f32 %v6552_v61, %v3022_v17  ;;  %5592 = vmatmul.mubr.msk.bf16.gmra.mrb[24].mxu1 %vm3245_vm6, %v3203_v5  ;;  %v3156_v26 = vmax.f32 %v3092_v16, 0.0  ;;  %v6017_v16 = vunpack.i.h.bf16 %v6015_v3  ;;  %v2969_v22 = vmul.f32 %v6016_v9, %v6545_v52 }
 0x223   : > { %v3091_v25 = vadd.f32 %v6552_v61, %v3020_v21  ;;  %v3154_v29 = vmax.f32 %v3090_v20, 0.0 }
 0x224   : > { %v3157_v27 = vmax.f32 %v3093_v23, 0.0 }
 0x225   : > { %v3155_v30 = vmax.f32 %v3091_v25, 0.0  ;;  %v5533_v31 = vpop.f32.mrb[32].mxu0 }
 0x226   : > { %v3205_v33 = vpack.c.bf16 %v3157_v27, %v3156_v26  ;;  %v3025_v34 = vadd.f32 %v5533_v31, %v2961_v28  ;;  %v2282_v35 = vpop.f32.mrb[33].mxu0  ;;  %v2967_v26 = vmul.f32 %v6011_v13, %v6545_v52  ;;  %v6025_v31 = vpop.permute.xlu1 %6024 }
 0x227   : > { %v3204_v38 = vpack.c.bf16 %v3155_v30, %v3154_v29  ;;  %v3023_v39 = vadd.f32 %v2959_v32, %v2282_v35  ;;  %v5534_v40 = vpop.f32.mrb[34].mxu0  ;;  %v2970_v30 = vmul.f32 %v6017_v16, %v6545_v52  ;;  %v2968_v35 = vmul.f32 %v6012_v18, %v6545_v52 }
 0x228   : > { %v3096_v44 = vadd.f32 %v6552_v61, %v3025_v34  ;;  %v3026_v46 = vadd.f32 %v5534_v40, %v2962_v36  ;;  %v2285_v47 = vpop.f32.mrb[35].mxu0  ;;  %v6020_v36 = vpop.permute.xlu0 %6019  ;;  %v6026_v37 = vunpack.i.l.bf16 %v6025_v31 }
 0x229   : > { %v3094_v49 = vadd.f32 %v6552_v61, %v3023_v39  ;;  %v3024_v50 = vadd.f32 %v2960_v41, %v2285_v47  ;;  %5595 = vmatprep.mubr.msk.bf16.mxu1 %vm3245_vm6, %v3204_v38  ;;  %v6021_v41 = vunpack.i.l.bf16 %v6020_v36  ;;  %v6022_v47 = vunpack.i.h.bf16 %v6020_v36 }
 0x22a   : > { %v3097_v53 = vadd.f32 %v6552_v61, %v3026_v46  ;;  %5596 = vmatmul.mubr.msk.bf16.gmra.mrb[28].mxu1 %vm3245_vm6, %v3205_v33  ;;  %v3160_v56 = vmax.f32 %v3096_v44, 0.0  ;;  %v6027_v44 = vunpack.i.h.bf16 %v6025_v31  ;;  %v2973_v51 = vmul.f32 %v6026_v37, %v6545_v52 }
 0x22b   : > { %v3095_v55 = vadd.f32 %v6552_v61, %v3024_v50  ;;  %v3158_v59 = vmax.f32 %v3094_v49, 0.0 }
 0x22c   : > { %v3161_v57 = vmax.f32 %v3097_v53, 0.0 }
 0x22d   : > { %v3159_v60 = vmax.f32 %v3095_v55, 0.0  ;;  %v5537_v45 = vpop.f32.mrb[36].mxu0 }
 0x22e   : > { %v3207_v63 = vpack.c.bf16 %v3161_v57, %v3160_v56  ;;  %v3029_v0 = vadd.f32 %v5537_v45, %v2965_v58  ;;  %v2298_v1 = vpop.f32.mrb[37].mxu0  ;;  %v2971_v56 = vmul.f32 %v6021_v41, %v6545_v52  ;;  %v6035_v45 = vpop.permute.xlu1 %6034 }
 0x22f   : > { %v3206_v4 = vpack.c.bf16 %v3159_v60, %v3158_v59  ;;  %v3027_v5 = vadd.f32 %v2963_v62, %v2298_v1  ;;  %v5538_v6 = vpop.f32.mrb[38].mxu0  ;;  %v2974_v60 = vmul.f32 %v6027_v44, %v6545_v52  ;;  %v2972_v1 = vmul.f32 %v6022_v47, %v6545_v52 }
 0x230   : > { %v3100_v10 = vadd.f32 %v6552_v61, %v3029_v0  ;;  %v3030_v11 = vadd.f32 %v5538_v6, %v2966_v2  ;;  %v2301_v12 = vpop.f32.mrb[39].mxu0  ;;  %v6030_v2 = vpop.permute.xlu0 %6029  ;;  %v6036_v3 = vunpack.i.l.bf16 %v6035_v45 }
 0x231   : > { %v3098_v14 = vadd.f32 %v6552_v61, %v3027_v5  ;;  %v3028_v15 = vadd.f32 %v2964_v7, %v2301_v12  ;;  %5599 = vmatprep.mubr.msk.bf16.mxu1 %vm3245_vm6, %v3206_v4  ;;  %v6031_v7 = vunpack.i.l.bf16 %v6030_v2  ;;  %v6032_v12 = vunpack.i.h.bf16 %v6030_v2 }
 0x232   : > { %v3101_v17 = vadd.f32 %v6552_v61, %v3030_v11  ;;  %5600 = vmatmul.mubr.msk.bf16.gmra.mrb[32].mxu1 %vm3245_vm6, %v3207_v63  ;;  %v3164_v20 = vmax.f32 %v3100_v10, 0.0  ;;  %v6037_v10 = vunpack.i.h.bf16 %v6035_v45  ;;  %v2977_v16 = vmul.f32 %v6036_v3, %v6545_v52 }
 0x233   : > { %v3099_v19 = vadd.f32 %v6552_v61, %v3028_v15  ;;  %v3162_v23 = vmax.f32 %v3098_v14, 0.0 }
 0x234   : > { %v3165_v21 = vmax.f32 %v3101_v17, 0.0 }
 0x235   : > { %v3163_v24 = vmax.f32 %v3099_v19, 0.0  ;;  %v5541_v25 = vpop.f32.mrb[40].mxu0 }
 0x236   : > { %v3209_v27 = vpack.c.bf16 %v3165_v21, %v3164_v20  ;;  %v3033_v28 = vadd.f32 %v5541_v25, %v2969_v22  ;;  %v2314_v29 = vpop.f32.mrb[41].mxu0  ;;  %v2975_v20 = vmul.f32 %v6031_v7, %v6545_v52  ;;  %v6045_v25 = vpop.permute.xlu1 %6044 }
 0x237   : > { %v3208_v32 = vpack.c.bf16 %v3163_v24, %v3162_v23  ;;  %v3031_v33 = vadd.f32 %v2967_v26, %v2314_v29  ;;  %v5542_v34 = vpop.f32.mrb[42].mxu0  ;;  %v2978_v24 = vmul.f32 %v6037_v10, %v6545_v52  ;;  %v2976_v29 = vmul.f32 %v6032_v12, %v6545_v52 }
 0x238   : > { %v3104_v38 = vadd.f32 %v6552_v61, %v3033_v28  ;;  %v3034_v39 = vadd.f32 %v5542_v34, %v2970_v30  ;;  %v2317_v40 = vpop.f32.mrb[43].mxu0  ;;  %v6040_v30 = vpop.permute.xlu0 %6039  ;;  %v6046_v31 = vunpack.i.l.bf16 %v6045_v25 }
 0x239   : > { %v3102_v42 = vadd.f32 %v6552_v61, %v3031_v33  ;;  %v3032_v43 = vadd.f32 %v2968_v35, %v2317_v40  ;;  %5603 = vmatprep.mubr.msk.bf16.mxu1 %vm3245_vm6, %v3208_v32  ;;  %v6041_v35 = vunpack.i.l.bf16 %v6040_v30  ;;  %v6042_v40 = vunpack.i.h.bf16 %v6040_v30 }
 0x23a   : > { %v3105_v46 = vadd.f32 %v6552_v61, %v3034_v39  ;;  %5604 = vmatmul.mubr.msk.bf16.gmra.mrb[36].mxu1 %vm3245_vm6, %v3209_v27  ;;  %v3168_v49 = vmax.f32 %v3104_v38, 0.0  ;;  %v6047_v38 = vunpack.i.h.bf16 %v6045_v25  ;;  %v2981_v44 = vmul.f32 %v6046_v31, %v6545_v52 }
 0x23b   : > { %v3103_v48 = vadd.f32 %v6552_v61, %v3032_v43  ;;  %v3166_v53 = vmax.f32 %v3102_v42, 0.0 }
 0x23c   : > { %v3169_v50 = vmax.f32 %v3105_v46, 0.0 }
 0x23d   : > { %v3167_v54 = vmax.f32 %v3103_v48, 0.0  ;;  %v5545_v55 = vpop.f32.mrb[44].mxu0 }
 0x23e   : > { %v3211_v57 = vpack.c.bf16 %v3169_v50, %v3168_v49  ;;  %v3037_v58 = vadd.f32 %v5545_v55, %v2973_v51  ;;  %v2330_v59 = vpop.f32.mrb[45].mxu0  ;;  %v2979_v49 = vmul.f32 %v6041_v35, %v6545_v52  ;;  %v6055_v55 = vpop.permute.xlu1 %6054 }
 0x23f   : > { %v3210_v62 = vpack.c.bf16 %v3167_v54, %v3166_v53  ;;  %v3035_v63 = vadd.f32 %v2971_v56, %v2330_v59  ;;  %v5546_v0 = vpop.f32.mrb[46].mxu0  ;;  %v2982_v54 = vmul.f32 %v6047_v38, %v6545_v52  ;;  %v2980_v59 = vmul.f32 %v6042_v40, %v6545_v52 }
 0x240   : > { %v3108_v4 = vadd.f32 %v6552_v61, %v3037_v58  ;;  %v3038_v5 = vadd.f32 %v5546_v0, %v2974_v60  ;;  %v2333_v6 = vpop.f32.mrb[47].mxu0  ;;  %v6050_v60 = vpop.permute.xlu0 %6049  ;;  %v6056_v45 = vunpack.i.l.bf16 %v6055_v55 }
 0x241   : > { %v3106_v8 = vadd.f32 %v6552_v61, %v3035_v63  ;;  %v3036_v9 = vadd.f32 %v2972_v1, %v2333_v6  ;;  %5607 = vmatprep.mubr.msk.bf16.mxu1 %vm3245_vm6, %v3210_v62  ;;  %v6051_v1 = vunpack.i.l.bf16 %v6050_v60  ;;  %v6052_v6 = vunpack.i.h.bf16 %v6050_v60 }
 0x242   : > { %v3109_v11 = vadd.f32 %v6552_v61, %v3038_v5  ;;  %5608 = vmatmul.mubr.msk.bf16.gmra.mrb[40].mxu1 %vm3245_vm6, %v3211_v57  ;;  %v3172_v14 = vmax.f32 %v3108_v4, 0.0  ;;  %v6057_v4 = vunpack.i.h.bf16 %v6055_v55  ;;  %v2985_v10 = vmul.f32 %v6056_v45, %v6545_v52  ;;  %v6065_v12 = vpop.permute.xlu1 %6064 }
 0x243   : > { %v3107_v13 = vadd.f32 %v6552_v61, %v3036_v9  ;;  %v3170_v17 = vmax.f32 %v3106_v8, 0.0  ;;  %v2984_v25 = vmul.f32 %v6052_v6, %v6545_v52 }
 0x244   : > { %v3173_v15 = vmax.f32 %v3109_v11, 0.0  ;;  %v6698_v11 = vld [vmem:[%s7273_s12] sm:$0xff]  }
 0x245   : > { %v3171_v18 = vmax.f32 %v3107_v13, 0.0  ;;  %v5549_v19 = vpop.f32.mrb[48].mxu0  ;;  %5699 = vmatprep.subr.bf16.mxu1 %v6698_v11 }
 0x246   : > { %v3213_v21 = vpack.c.bf16 %v3173_v15, %v3172_v14  ;;  %v3041_v22 = vadd.f32 %v5549_v19, %v2977_v16  ;;  %v2346_v23 = vpop.f32.mrb[49].mxu0  ;;  %v2983_v16 = vmul.f32 %v6051_v1, %v6545_v52 }
 0x247   : > { %v3212_v26 = vpack.c.bf16 %v3171_v18, %v3170_v17  ;;  %v3039_v27 = vadd.f32 %v2975_v20, %v2346_v23  ;;  %v5550_v28 = vpop.f32.mrb[50].mxu0  ;;  %v6060_v17 = vpop.permute.xlu0 %6059 }
 0x248   : > { %v3112_v32 = vadd.f32 %v6552_v61, %v3041_v22  ;;  %v3042_v33 = vadd.f32 %v5550_v28, %v2978_v24  ;;  %v2349_v34 = vpop.f32.mrb[51].mxu0  ;;  %v6061_v30 = vunpack.i.l.bf16 %v6060_v17  ;;  %v6062_v35 = vunpack.i.h.bf16 %v6060_v17 }
 0x249   : > { %v3110_v36 = vadd.f32 %v6552_v61, %v3039_v27  ;;  %v3040_v37 = vadd.f32 %v2976_v29, %v2349_v34  ;;  %5611 = vmatprep.mubr.msk.bf16.mxu1 %vm3245_vm6, %v3212_v26  ;;  %v6066_v26 = vunpack.i.l.bf16 %v6065_v12 }
 0x24a   : > { %v3113_v39 = vadd.f32 %v6552_v61, %v3042_v33  ;;  %5612 = vmatmul.mubr.msk.bf16.gmra.mrb[44].mxu1 %vm3245_vm6, %v3213_v21  ;;  %v3176_v42 = vmax.f32 %v3112_v32, 0.0  ;;  %v2986_v21 = vmul.f32 %v6057_v4, %v6545_v52  ;;  %v6067_v33 = vunpack.i.h.bf16 %v6065_v12 }
 0x24b   : > { %v3111_v41 = vadd.f32 %v6552_v61, %v3040_v37  ;;  %v3174_v46 = vmax.f32 %v3110_v36, 0.0 }
 0x24c   : > { %v3177_v43 = vmax.f32 %v3113_v39, 0.0  ;;  %v2989_v39 = vmul.f32 %v6066_v26, %v6545_v52 }
 0x24d   : > { %v3175_v47 = vmax.f32 %v3111_v41, 0.0  ;;  %v5553_v48 = vpop.f32.mrb[52].mxu0 }
 0x24e   : > { %v3215_v50 = vpack.c.bf16 %v3177_v43, %v3176_v42  ;;  %v3045_v51 = vadd.f32 %v5553_v48, %v2981_v44  ;;  %v2362_v53 = vpop.f32.mrb[53].mxu0  ;;  %v2987_v43 = vmul.f32 %v6061_v30, %v6545_v52  ;;  %v2990_v48 = vmul.f32 %v6067_v33, %v6545_v52 }
 0x24f   : > { %v3214_v56 = vpack.c.bf16 %v3175_v47, %v3174_v46  ;;  %v3043_v57 = vadd.f32 %v2979_v49, %v2362_v53  ;;  %v5554_v58 = vpop.f32.mrb[54].mxu0  ;;  %v2988_v53 = vmul.f32 %v6062_v35, %v6545_v52 }
 0x250   : > { %v3116_v62 = vadd.f32 %v6552_v61, %v3045_v51  ;;  %v3046_v63 = vadd.f32 %v5554_v58, %v2982_v54  ;;  %v2365_v0 = vpop.f32.mrb[55].mxu0 }
 0x251   : > { %v3114_v2 = vadd.f32 %v6552_v61, %v3043_v57  ;;  %v3044_v3 = vadd.f32 %v2980_v59, %v2365_v0  ;;  %5615 = vmatprep.mubr.msk.bf16.mxu1 %vm3245_vm6, %v3214_v56 }
 0x252   : > { %v3117_v5 = vadd.f32 %v6552_v61, %v3046_v63  ;;  %5616 = vmatmul.mubr.msk.bf16.gmra.mrb[48].mxu1 %vm3245_vm6, %v3215_v50  ;;  %v3180_v8 = vmax.f32 %v3116_v62, 0.0 }
 0x253   : > { %v3115_v7 = vadd.f32 %v6552_v61, %v3044_v3  ;;  %v3178_v13 = vmax.f32 %v3114_v2, 0.0  ;;  %v6725_v2 = vld [vmem:[%s7271_s10] ss:$0 sm:$0xff] }
 0x254   : > { %v3181_v9 = vmax.f32 %v3117_v5, 0.0 }
 0x255   : > { %v3179_v14 = vmax.f32 %v3115_v7, 0.0  ;;  %v5557_v15 = vpop.f32.mrb[56].mxu0 }
 0x256   : > { %v3217_v18 = vpack.c.bf16 %v3181_v9, %v3180_v8  ;;  %v3049_v19 = vadd.f32 %v5557_v15, %v2985_v10  ;;  %v2378_v20 = vpop.f32.mrb[57].mxu0 }
 0x257   : > { %v3216_v22 = vpack.c.bf16 %v3179_v14, %v3178_v13  ;;  %v3047_v23 = vadd.f32 %v2983_v16, %v2378_v20  ;;  %v5558_v24 = vpop.f32.mrb[58].mxu0  ;;  %v6171_v20 = vld [vmem:[%s7273_s12 + $0x8] sm:$0xff]  }
 0x258   : > { %v3120_v27 = vadd.f32 %v6552_v61, %v3049_v19  ;;  %v3050_v28 = vadd.f32 %v5558_v24, %v2986_v21  ;;  %v2381_v29 = vpop.f32.mrb[59].mxu0 }
 0x259   : > { %v3118_v31 = vadd.f32 %v6552_v61, %v3047_v23  ;;  %v3048_v32 = vadd.f32 %v2984_v25, %v2381_v29  ;;  %5619 = vmatprep.mubr.msk.bf16.mxu1 %vm3245_vm6, %v3216_v22 }
 0x25a   : > { %v3121_v34 = vadd.f32 %v6552_v61, %v3050_v28  ;;  %5620 = vmatmul.mubr.msk.bf16.gmra.mrb[52].mxu1 %vm3245_vm6, %v3217_v18  ;;  %v3184_v37 = vmax.f32 %v3120_v27, 0.0 }
 0x25b   : > { %v3119_v36 = vadd.f32 %v6552_v61, %v3048_v32  ;;  %v3182_v40 = vmax.f32 %v3118_v31, 0.0 }
 0x25c   : > { %v3185_v38 = vmax.f32 %v3121_v34, 0.0 }
 0x25d   : > { %v3183_v41 = vmax.f32 %v3119_v36, 0.0  ;;  %v5561_v42 = vpop.f32.mrb[60].mxu0 }
 0x25e   : > { %v3219_v44 = vpack.c.bf16 %v3185_v38, %v3184_v37  ;;  %v3053_v46 = vadd.f32 %v5561_v42, %v2989_v39  ;;  %v2394_v47 = vpop.f32.mrb[61].mxu0 }
 0x25f   : > { %v3218_v49 = vpack.c.bf16 %v3183_v41, %v3182_v40  ;;  %v3051_v50 = vadd.f32 %v2987_v43, %v2394_v47  ;;  %v5562_v51 = vpop.f32.mrb[62].mxu0 }
 0x260   : > { %v3124_v54 = vadd.f32 %v6552_v61, %v3053_v46  ;;  %v3054_v55 = vadd.f32 %v5562_v51, %v2990_v48  ;;  %v2397_v56 = vpop.f32.mrb[63].mxu0 }
 0x261   : > { %v3122_v57 = vadd.f32 %v6552_v61, %v3051_v50  ;;  %v3052_v58 = vadd.f32 %v2988_v53, %v2397_v56  ;;  %5623 = vmatprep.mubr.msk.bf16.mxu1 %vm3245_vm6, %v3218_v49 }
 0x262   : > { %v3125_v59 = vadd.f32 %v6552_v61, %v3054_v55  ;;  %5624 = vmatmul.mubr.msk.bf16.gmra.mrb[56].mxu1 %vm3245_vm6, %v3219_v44  ;;  %v3188_v45 = vmax.f32 %v3124_v54, 0.0 }
 0x263   : > { %v3123_v60 = vadd.f32 %v6552_v61, %v3052_v58  ;;  %v3186_v63 = vmax.f32 %v3122_v57, 0.0 }
 0x264   : > { %v3189_v62 = vmax.f32 %v3125_v59, 0.0 }
 0x265   : > { %v3187_v0 = vmax.f32 %v3123_v60, 0.0 }
 0x266   : > { %v3221_v52 = vpack.c.bf16 %v3189_v62, %v3188_v45 }
 0x267   : > { %v3220_v1 = vpack.c.bf16 %v3187_v0, %v3186_v63 }
 0x269   : > { %5627 = vmatprep.mubr.msk.bf16.mxu1 %vm3245_vm6, %v3220_v1 }
 0x26a   : > { %5628 = vmatmul.mubr.msk.bf16.gmra.mrb[60].mxu1 %vm3245_vm6, %v3221_v52 }
 0x2c5   : > { %v5569_v3 = vpop.f32.mrb[0].mxu1 }
 0x2c6   : > { %v3385_v4 = vadd.f32 %v5569_v3, %v6725_v2  ;;  %v3376_v5 = vpop.f32.mrb[1].mxu1 }
 0x2c7   : > { %v3377_v61 = vadd.f32 %v6725_v2, %v3376_v5  ;;  %v5570_v6 = vpop.f32.mrb[2].mxu1 }
 0x2c8   : > { %v3388_v7 = vadd.f32 %v5570_v6, %v6725_v2  ;;  %v3379_v8 = vpop.f32.mrb[3].mxu1  ;;  %v3633_v10 = vmax.f32 %v3385_v4, 0.0 }
 0x2c9   : > { %v3380_v9 = vadd.f32 %v6725_v2, %v3379_v8  ;;  %v3631_v13 = vmax.f32 %v3377_v61, 0.0 }
 0x2ca   : > { %v3634_v12 = vmax.f32 %v3388_v7, 0.0 }
 0x2cb   : > { %v3632_v14 = vmax.f32 %v3380_v9, 0.0 }
 0x2cc   : > { %v6731_v15 = vpack.c.bf16 %v3634_v12, %v3633_v10 }
 0x2cd   : > { %v6733_v16 = vpack.c.bf16 %v3632_v14, %v3631_v13  ;;  %v5573_v17 = vpop.f32.mrb[4].mxu1 }
 0x2ce   : > { %v3401_v18 = vadd.f32 %v5573_v17, %v6725_v2  ;;  %v3392_v19 = vpop.f32.mrb[5].mxu1 }
 0x2cf   : > { %v3393_v21 = vadd.f32 %v6725_v2, %v3392_v19  ;;  %v5574_v22 = vpop.f32.mrb[6].mxu1  ;;  %5635 = vmatprep.mubr.msk.bf16.mxu1 %vm3245_vm6, %v6733_v16 }
 0x2d0   : > { %v3404_v23 = vadd.f32 %v5574_v22, %v6725_v2  ;;  %v3395_v24 = vpop.f32.mrb[7].mxu1  ;;  %5636 = vmatmul.mubr.msk.bf16.vlgmr.msra.gmra.mrb[64].mxu1 %vm3245_vm6, %v6731_v15  ;;  %v3637_v26 = vmax.f32 %v3401_v18, 0.0 }
 0x2d1   : > { %v3396_v25 = vadd.f32 %v6725_v2, %v3395_v24  ;;  %5700 = vmatpush3.bf16.msra.mxu1 %v6698_v11  ;;  %v3635_v28 = vmax.f32 %v3393_v21, 0.0 }
 0x2d2   : > { %v3638_v27 = vmax.f32 %v3404_v23, 0.0  ;;  %5701 = vmatprep.subr.bf16.mxu1 %v6171_v20 }
 0x2d3   : > { %v3636_v29 = vmax.f32 %v3396_v25, 0.0 }
 0x2d4   : > { %v6747_v30 = vpack.c.bf16 %v3638_v27, %v3637_v26 }
 0x2d5   : > { %v6749_v31 = vpack.c.bf16 %v3636_v29, %v3635_v28  ;;  %v5577_v32 = vpop.f32.mrb[8].mxu1  ;;  %5702 = vmatpush3.bf16.msra.mxu1 %v6171_v20 }
 0x2d6   : > { %v3417_v33 = vadd.f32 %v5577_v32, %v6725_v2  ;;  %v3408_v34 = vpop.f32.mrb[9].mxu1 }
 0x2d7   : > { %v3409_v35 = vadd.f32 %v6725_v2, %v3408_v34  ;;  %v5578_v36 = vpop.f32.mrb[10].mxu1  ;;  %5639 = vmatprep.mubr.msk.bf16.mxu1 %vm3245_vm6, %v6749_v31 }
 0x2d8   : > { %v3420_v11 = vadd.f32 %v5578_v36, %v6725_v2  ;;  %v3411_v37 = vpop.f32.mrb[11].mxu1  ;;  %5640 = vmatmul.mubr.msk.bf16.gmra.mrb[68].mxu1 %vm3245_vm6, %v6747_v30  ;;  %v3641_v39 = vmax.f32 %v3417_v33, 0.0 }
 0x2d9   : > { %v3412_v38 = vadd.f32 %v6725_v2, %v3411_v37  ;;  %v3639_v41 = vmax.f32 %v3409_v35, 0.0 }
 0x2da   : > { %v3642_v40 = vmax.f32 %v3420_v11, 0.0 }
 0x2db   : > { %v3640_v42 = vmax.f32 %v3412_v38, 0.0 }
 0x2dc   : > { %v6759_v43 = vpack.c.bf16 %v3642_v40, %v3641_v39 }
 0x2dd   : > { %v6761_v44 = vpack.c.bf16 %v3640_v42, %v3639_v41  ;;  %v5581_v46 = vpop.f32.mrb[12].mxu1 }
 0x2de   : > { %v3433_v47 = vadd.f32 %v5581_v46, %v6725_v2  ;;  %v3424_v48 = vpop.f32.mrb[13].mxu1 }
 0x2df   : > { %v3425_v49 = vadd.f32 %v6725_v2, %v3424_v48  ;;  %v5582_v50 = vpop.f32.mrb[14].mxu1  ;;  %5643 = vmatprep.mubr.msk.bf16.mxu1 %vm3245_vm6, %v6761_v44 }
 0x2e0   : > { %v3436_v51 = vadd.f32 %v5582_v50, %v6725_v2  ;;  %v3427_v53 = vpop.f32.mrb[15].mxu1  ;;  %5644 = vmatmul.mubr.msk.bf16.gmra.mrb[72].mxu1 %vm3245_vm6, %v6759_v43  ;;  %v3645_v55 = vmax.f32 %v3433_v47, 0.0 }
 0x2e1   : > { %v3428_v54 = vadd.f32 %v6725_v2, %v3427_v53  ;;  %v3643_v57 = vmax.f32 %v3425_v49, 0.0 }
 0x2e2   : > { %v3646_v56 = vmax.f32 %v3436_v51, 0.0 }
 0x2e3   : > { %v3644_v58 = vmax.f32 %v3428_v54, 0.0 }
 0x2e4   : > { %v6771_v59 = vpack.c.bf16 %v3646_v56, %v3645_v55 }
 0x2e5   : > { %v6773_v60 = vpack.c.bf16 %v3644_v58, %v3643_v57  ;;  %v5585_v45 = vpop.f32.mrb[16].mxu1 }
 0x2e6   : > { %v3449_v62 = vadd.f32 %v5585_v45, %v6725_v2  ;;  %v3440_v63 = vpop.f32.mrb[17].mxu1 }
 0x2e7   : > { %v3441_v0 = vadd.f32 %v6725_v2, %v3440_v63  ;;  %v5586_v52 = vpop.f32.mrb[18].mxu1  ;;  %5647 = vmatprep.mubr.msk.bf16.mxu1 %vm3245_vm6, %v6773_v60 }
 0x2e8   : > { %v3452_v1 = vadd.f32 %v5586_v52, %v6725_v2  ;;  %v3443_v3 = vpop.f32.mrb[19].mxu1  ;;  %5648 = vmatmul.mubr.msk.bf16.gmra.mrb[76].mxu1 %vm3245_vm6, %v6771_v59  ;;  %v3649_v5 = vmax.f32 %v3449_v62, 0.0 }
 0x2e9   : > { %v3444_v4 = vadd.f32 %v6725_v2, %v3443_v3  ;;  %v3647_v6 = vmax.f32 %v3441_v0, 0.0 }
 0x2ea   : > { %v3650_v61 = vmax.f32 %v3452_v1, 0.0 }
 0x2eb   : > { %v3648_v7 = vmax.f32 %v3444_v4, 0.0 }
 0x2ec   : > { %v6783_v8 = vpack.c.bf16 %v3650_v61, %v3649_v5 }
 0x2ed   : > { %v6785_v9 = vpack.c.bf16 %v3648_v7, %v3647_v6  ;;  %v5589_v10 = vpop.f32.mrb[20].mxu1 }
 0x2ee   : > { %v3465_v12 = vadd.f32 %v5589_v10, %v6725_v2  ;;  %v3456_v13 = vpop.f32.mrb[21].mxu1 }
 0x2ef   : > { %v3457_v14 = vadd.f32 %v6725_v2, %v3456_v13  ;;  %v5590_v17 = vpop.f32.mrb[22].mxu1  ;;  %5651 = vmatprep.mubr.msk.bf16.mxu1 %vm3245_vm6, %v6785_v9 }
 0x2f0   : > { %v3468_v18 = vadd.f32 %v5590_v17, %v6725_v2  ;;  %v3459_v19 = vpop.f32.mrb[23].mxu1  ;;  %5652 = vmatmul.mubr.msk.bf16.gmra.mrb[80].mxu1 %vm3245_vm6, %v6783_v8  ;;  %v3653_v21 = vmax.f32 %v3465_v12, 0.0 }
 0x2f1   : > { %v3460_v20 = vadd.f32 %v6725_v2, %v3459_v19  ;;  %v3651_v23 = vmax.f32 %v3457_v14, 0.0 }
 0x2f2   : > { %v3654_v22 = vmax.f32 %v3468_v18, 0.0 }
 0x2f3   : > { %v3652_v24 = vmax.f32 %v3460_v20, 0.0 }
 0x2f4   : > { %v6795_v25 = vpack.c.bf16 %v3654_v22, %v3653_v21 }
 0x2f5   : > { %v6797_v26 = vpack.c.bf16 %v3652_v24, %v3651_v23  ;;  %v5593_v27 = vpop.f32.mrb[24].mxu1 }
 0x2f6   : > { %v3481_v28 = vadd.f32 %v5593_v27, %v6725_v2  ;;  %v3472_v29 = vpop.f32.mrb[25].mxu1 }
 0x2f7   : > { %v3473_v32 = vadd.f32 %v6725_v2, %v3472_v29  ;;  %v5594_v33 = vpop.f32.mrb[26].mxu1  ;;  %5655 = vmatprep.mubr.msk.bf16.mxu1 %vm3245_vm6, %v6797_v26 }
 0x2f8   : > { %v3484_v34 = vadd.f32 %v5594_v33, %v6725_v2  ;;  %v3475_v35 = vpop.f32.mrb[27].mxu1  ;;  %5656 = vmatmul.mubr.msk.bf16.gmra.mrb[84].mxu1 %vm3245_vm6, %v6795_v25  ;;  %v3657_v11 = vmax.f32 %v3481_v28, 0.0 }
 0x2f9   : > { %v3476_v36 = vadd.f32 %v6725_v2, %v3475_v35  ;;  %v3655_v38 = vmax.f32 %v3473_v32, 0.0 }
 0x2fa   : > { %v3658_v37 = vmax.f32 %v3484_v34, 0.0 }
 0x2fb   : > { %v3656_v39 = vmax.f32 %v3476_v36, 0.0 }
 0x2fc   : > { %v6807_v40 = vpack.c.bf16 %v3658_v37, %v3657_v11 }
 0x2fd   : > { %v6809_v41 = vpack.c.bf16 %v3656_v39, %v3655_v38  ;;  %v5597_v42 = vpop.f32.mrb[28].mxu1 }
 0x2fe   : > { %v3497_v46 = vadd.f32 %v5597_v42, %v6725_v2  ;;  %v3488_v47 = vpop.f32.mrb[29].mxu1 }
 0x2ff   : > { %v3489_v48 = vadd.f32 %v6725_v2, %v3488_v47  ;;  %v5598_v49 = vpop.f32.mrb[30].mxu1  ;;  %5659 = vmatprep.mubr.msk.bf16.mxu1 %vm3245_vm6, %v6809_v41 }
 0x300   : > { %v3500_v50 = vadd.f32 %v5598_v49, %v6725_v2  ;;  %v3491_v51 = vpop.f32.mrb[31].mxu1  ;;  %5660 = vmatmul.mubr.msk.bf16.gmra.mrb[88].mxu1 %vm3245_vm6, %v6807_v40  ;;  %v3661_v54 = vmax.f32 %v3497_v46, 0.0 }
 0x301   : > { %v3492_v53 = vadd.f32 %v6725_v2, %v3491_v51  ;;  %v3659_v56 = vmax.f32 %v3489_v48, 0.0 }
 0x302   : > { %v3662_v55 = vmax.f32 %v3500_v50, 0.0 }
 0x303   : > { %v3660_v57 = vmax.f32 %v3492_v53, 0.0 }
 0x304   : > { %v6819_v58 = vpack.c.bf16 %v3662_v55, %v3661_v54 }
 0x305   : > { %v6821_v45 = vpack.c.bf16 %v3660_v57, %v3659_v56  ;;  %v5601_v62 = vpop.f32.mrb[32].mxu1 }
 0x306   : > { %v3513_v63 = vadd.f32 %v5601_v62, %v6725_v2  ;;  %v3504_v0 = vpop.f32.mrb[33].mxu1 }
 0x307   : > { %v3505_v52 = vadd.f32 %v6725_v2, %v3504_v0  ;;  %v5602_v1 = vpop.f32.mrb[34].mxu1  ;;  %5663 = vmatprep.mubr.msk.bf16.mxu1 %vm3245_vm6, %v6821_v45 }
 0x308   : > { %v3516_v3 = vadd.f32 %v5602_v1, %v6725_v2  ;;  %v3507_v4 = vpop.f32.mrb[35].mxu1  ;;  %5664 = vmatmul.mubr.msk.bf16.gmra.mrb[92].mxu1 %vm3245_vm6, %v6819_v58  ;;  %v3665_v61 = vmax.f32 %v3513_v63, 0.0 }
 0x309   : > { %v3508_v5 = vadd.f32 %v6725_v2, %v3507_v4  ;;  %v3663_v7 = vmax.f32 %v3505_v52, 0.0 }
 0x30a   : > { %v3666_v6 = vmax.f32 %v3516_v3, 0.0 }
 0x30b   : > { %v3664_v10 = vmax.f32 %v3508_v5, 0.0 }
 0x30c   : > { %v6831_v12 = vpack.c.bf16 %v3666_v6, %v3665_v61 }
 0x30d   : > { %v6833_v13 = vpack.c.bf16 %v3664_v10, %v3663_v7  ;;  %v5605_v14 = vpop.f32.mrb[36].mxu1 }
 0x30e   : > { %v3529_v17 = vadd.f32 %v5605_v14, %v6725_v2  ;;  %v3520_v18 = vpop.f32.mrb[37].mxu1 }
 0x30f   : > { %v3521_v19 = vadd.f32 %v6725_v2, %v3520_v18  ;;  %v5606_v20 = vpop.f32.mrb[38].mxu1  ;;  %5667 = vmatprep.mubr.msk.bf16.mxu1 %vm3245_vm6, %v6833_v13 }
 0x310   : > { %v3532_v21 = vadd.f32 %v5606_v20, %v6725_v2  ;;  %v3523_v22 = vpop.f32.mrb[39].mxu1  ;;  %5668 = vmatmul.mubr.msk.bf16.gmra.mrb[96].mxu1 %vm3245_vm6, %v6831_v12  ;;  %v3669_v24 = vmax.f32 %v3529_v17, 0.0 }
 0x311   : > { %v3524_v23 = vadd.f32 %v6725_v2, %v3523_v22  ;;  %v3667_v28 = vmax.f32 %v3521_v19, 0.0 }
 0x312   : > { %v3670_v27 = vmax.f32 %v3532_v21, 0.0 }
 0x313   : > { %v3668_v29 = vmax.f32 %v3524_v23, 0.0 }
 0x314   : > { %v6843_v32 = vpack.c.bf16 %v3670_v27, %v3669_v24 }
 0x315   : > { %v6845_v33 = vpack.c.bf16 %v3668_v29, %v3667_v28  ;;  %v5609_v34 = vpop.f32.mrb[40].mxu1 }
 0x316   : > { %v3545_v35 = vadd.f32 %v5609_v34, %v6725_v2  ;;  %v3536_v36 = vpop.f32.mrb[41].mxu1 }
 0x317   : > { %v3537_v11 = vadd.f32 %v6725_v2, %v3536_v36  ;;  %v5610_v37 = vpop.f32.mrb[42].mxu1  ;;  %5671 = vmatprep.mubr.msk.bf16.mxu1 %vm3245_vm6, %v6845_v33 }
 0x318   : > { %v3548_v38 = vadd.f32 %v5610_v37, %v6725_v2  ;;  %v3539_v39 = vpop.f32.mrb[43].mxu1  ;;  %5672 = vmatmul.mubr.msk.bf16.gmra.mrb[100].mxu1 %vm3245_vm6, %v6843_v32  ;;  %v3673_v46 = vmax.f32 %v3545_v35, 0.0 }
 0x319   : > { %v3540_v42 = vadd.f32 %v6725_v2, %v3539_v39  ;;  %v3671_v48 = vmax.f32 %v3537_v11, 0.0 }
 0x31a   : > { %v3674_v47 = vmax.f32 %v3548_v38, 0.0 }
 0x31b   : > { %v3672_v49 = vmax.f32 %v3540_v42, 0.0 }
 0x31c   : > { %v6855_v50 = vpack.c.bf16 %v3674_v47, %v3673_v46 }
 0x31d   : > { %v6857_v51 = vpack.c.bf16 %v3672_v49, %v3671_v48  ;;  %v5613_v53 = vpop.f32.mrb[44].mxu1 }
 0x31e   : > { %v3561_v54 = vadd.f32 %v5613_v53, %v6725_v2  ;;  %v3552_v55 = vpop.f32.mrb[45].mxu1 }
 0x31f   : > { %v3553_v56 = vadd.f32 %v6725_v2, %v3552_v55  ;;  %v5614_v57 = vpop.f32.mrb[46].mxu1  ;;  %5675 = vmatprep.mubr.msk.bf16.mxu1 %vm3245_vm6, %v6857_v51 }
 0x320   : > { %v3564_v62 = vadd.f32 %v5614_v57, %v6725_v2  ;;  %v3555_v63 = vpop.f32.mrb[47].mxu1  ;;  %5676 = vmatmul.mubr.msk.bf16.gmra.mrb[104].mxu1 %vm3245_vm6, %v6855_v50  ;;  %v3677_v52 = vmax.f32 %v3561_v54, 0.0 }
 0x321   : > { %v3556_v0 = vadd.f32 %v6725_v2, %v3555_v63  ;;  %v3675_v3 = vmax.f32 %v3553_v56, 0.0 }
 0x322   : > { %v3678_v1 = vmax.f32 %v3564_v62, 0.0 }
 0x323   : > { %v3676_v4 = vmax.f32 %v3556_v0, 0.0 }
 0x324   : > { %v6867_v5 = vpack.c.bf16 %v3678_v1, %v3677_v52 }
 0x325   : > { %v6869_v61 = vpack.c.bf16 %v3676_v4, %v3675_v3  ;;  %v5617_v6 = vpop.f32.mrb[48].mxu1 }
 0x326   : > { %v3577_v7 = vadd.f32 %v5617_v6, %v6725_v2  ;;  %v3568_v10 = vpop.f32.mrb[49].mxu1 }
 0x327   : > { %v3569_v14 = vadd.f32 %v6725_v2, %v3568_v10  ;;  %v5618_v17 = vpop.f32.mrb[50].mxu1  ;;  %5679 = vmatprep.mubr.msk.bf16.mxu1 %vm3245_vm6, %v6869_v61 }
 0x328   : > { %v3580_v18 = vadd.f32 %v5618_v17, %v6725_v2  ;;  %v3571_v19 = vpop.f32.mrb[51].mxu1  ;;  %5680 = vmatmul.mubr.msk.bf16.gmra.mrb[108].mxu1 %vm3245_vm6, %v6867_v5  ;;  %v3681_v21 = vmax.f32 %v3577_v7, 0.0 }
 0x329   : > { %v3572_v20 = vadd.f32 %v6725_v2, %v3571_v19  ;;  %v3679_v23 = vmax.f32 %v3569_v14, 0.0 }
 0x32a   : > { %v3682_v22 = vmax.f32 %v3580_v18, 0.0 }
 0x32b   : > { %v3680_v24 = vmax.f32 %v3572_v20, 0.0 }
 0x32c   : > { %v6879_v27 = vpack.c.bf16 %v3682_v22, %v3681_v21 }
 0x32d   : > { %v6881_v28 = vpack.c.bf16 %v3680_v24, %v3679_v23  ;;  %v5621_v29 = vpop.f32.mrb[52].mxu1 }
 0x32e   : > { %v3593_v34 = vadd.f32 %v5621_v29, %v6725_v2  ;;  %v3584_v35 = vpop.f32.mrb[53].mxu1 }
 0x32f   : > { %v3585_v36 = vadd.f32 %v6725_v2, %v3584_v35  ;;  %v5622_v11 = vpop.f32.mrb[54].mxu1  ;;  %5683 = vmatprep.mubr.msk.bf16.mxu1 %vm3245_vm6, %v6881_v28 }
 0x330   : > { %v3596_v37 = vadd.f32 %v5622_v11, %v6725_v2  ;;  %v3587_v38 = vpop.f32.mrb[55].mxu1  ;;  %5684 = vmatmul.mubr.msk.bf16.gmra.mrb[112].mxu1 %vm3245_vm6, %v6879_v27  ;;  %v3685_v42 = vmax.f32 %v3593_v34, 0.0 }
 0x331   : > { %v3588_v39 = vadd.f32 %v6725_v2, %v3587_v38  ;;  %v3683_v47 = vmax.f32 %v3585_v36, 0.0 }
 0x332   : > { %v3686_v46 = vmax.f32 %v3596_v37, 0.0 }
 0x333   : > { %v3684_v48 = vmax.f32 %v3588_v39, 0.0 }
 0x334   : > { %v6891_v49 = vpack.c.bf16 %v3686_v46, %v3685_v42 }
 0x335   : > { %v6893_v53 = vpack.c.bf16 %v3684_v48, %v3683_v47  ;;  %v5625_v54 = vpop.f32.mrb[56].mxu1 }
 0x336   : > { %v3609_v55 = vadd.f32 %v5625_v54, %v6725_v2  ;;  %v3600_v56 = vpop.f32.mrb[57].mxu1 }
 0x337   : > { %v3601_v57 = vadd.f32 %v6725_v2, %v3600_v56  ;;  %v5626_v62 = vpop.f32.mrb[58].mxu1  ;;  %5687 = vmatprep.mubr.msk.bf16.mxu1 %vm3245_vm6, %v6893_v53 }
 0x338   : > { %v3612_v63 = vadd.f32 %v5626_v62, %v6725_v2  ;;  %v3603_v0 = vpop.f32.mrb[59].mxu1  ;;  %5688 = vmatmul.mubr.msk.bf16.gmra.mrb[116].mxu1 %vm3245_vm6, %v6891_v49  ;;  %v3689_v1 = vmax.f32 %v3609_v55, 0.0 }
 0x339   : > { %v3604_v52 = vadd.f32 %v6725_v2, %v3603_v0  ;;  %v3687_v4 = vmax.f32 %v3601_v57, 0.0 }
 0x33a   : > { %v3690_v3 = vmax.f32 %v3612_v63, 0.0 }
 0x33b   : > { %v3688_v6 = vmax.f32 %v3604_v52, 0.0 }
 0x33c   : > { %v6903_v7 = vpack.c.bf16 %v3690_v3, %v3689_v1 }
 0x33d   : > { %v6905_v10 = vpack.c.bf16 %v3688_v6, %v3687_v4  ;;  %v5629_v14 = vpop.f32.mrb[60].mxu1 }
 0x33e   : > { %v3625_v17 = vadd.f32 %v5629_v14, %v6725_v2  ;;  %v3616_v18 = vpop.f32.mrb[61].mxu1 }
 0x33f   : > { %v3617_v19 = vadd.f32 %v6725_v2, %v3616_v18  ;;  %v5630_v20 = vpop.f32.mrb[62].mxu1  ;;  %5691 = vmatprep.mubr.msk.bf16.mxu1 %vm3245_vm6, %v6905_v10 }
 0x340   : > { %v3628_v21 = vadd.f32 %v5630_v20, %v6725_v2  ;;  %v3619_v22 = vpop.f32.mrb[63].mxu1  ;;  %5692 = vmatmul.mubr.msk.bf16.gmra.mrb[120].mxu1 %vm3245_vm6, %v6903_v7  ;;  %v3693_v24 = vmax.f32 %v3625_v17, 0.0 }
 0x341   : > { %v3620_v23 = vadd.f32 %v6725_v2, %v3619_v22  ;;  %v3691_v34 = vmax.f32 %v3617_v19, 0.0 }
 0x342   : > { %v3694_v29 = vmax.f32 %v3628_v21, 0.0 }
 0x343   : > { %v3692_v35 = vmax.f32 %v3620_v23, 0.0 }
 0x344   : > { %v6915_v36 = vpack.c.bf16 %v3694_v29, %v3693_v24 }
 0x345   : > { %v6917_v11 = vpack.c.bf16 %v3692_v35, %v3691_v34 }
 0x347   : > { %5695 = vmatprep.mubr.msk.bf16.mxu1 %vm3245_vm6, %v6917_v11 }
 0x348   : > { %5696 = vmatmul.mubr.msk.bf16.gmra.mrb[124].mxu1 %vm3245_vm6, %v6915_v36 }
 0x349   : > { %5703 = vmatprep.mubr.msk.bf16.mxu1 %vm3245_vm6, %v6733_v16 }
 0x350   : > { %5704 = vmatmul.mubr.msk.bf16.vlgmr.msra.gmra.mrb[128].mxu1 %vm3245_vm6, %v6731_v15 }
 0x351   : > { %5707 = vmatprep.mubr.msk.bf16.mxu1 %vm3245_vm6, %v6749_v31 }
 0x358   : > { %5708 = vmatmul.mubr.msk.bf16.gmra.mrb[132].mxu1 %vm3245_vm6, %v6747_v30 }
 0x359   : > { %5711 = vmatprep.mubr.msk.bf16.mxu1 %vm3245_vm6, %v6761_v44 }
 0x360   : > { %5712 = vmatmul.mubr.msk.bf16.gmra.mrb[136].mxu1 %vm3245_vm6, %v6759_v43 }
 0x361   : > { %5715 = vmatprep.mubr.msk.bf16.mxu1 %vm3245_vm6, %v6773_v60 }
 0x368   : > { %5716 = vmatmul.mubr.msk.bf16.gmra.mrb[140].mxu1 %vm3245_vm6, %v6771_v59 }
 0x369   : > { %5719 = vmatprep.mubr.msk.bf16.mxu1 %vm3245_vm6, %v6785_v9 }
 0x370   : > { %5720 = vmatmul.mubr.msk.bf16.gmra.mrb[144].mxu1 %vm3245_vm6, %v6783_v8 }
 0x371   : > { %5723 = vmatprep.mubr.msk.bf16.mxu1 %vm3245_vm6, %v6797_v26 }
 0x378   : > { %5724 = vmatmul.mubr.msk.bf16.gmra.mrb[148].mxu1 %vm3245_vm6, %v6795_v25 }
 0x379   : > { %5727 = vmatprep.mubr.msk.bf16.mxu1 %vm3245_vm6, %v6809_v41 }
 0x380   : > { %5728 = vmatmul.mubr.msk.bf16.gmra.mrb[152].mxu1 %vm3245_vm6, %v6807_v40 }
 0x381   : > { %5731 = vmatprep.mubr.msk.bf16.mxu1 %vm3245_vm6, %v6821_v45 }
 0x388   : > { %5732 = vmatmul.mubr.msk.bf16.gmra.mrb[156].mxu1 %vm3245_vm6, %v6819_v58 }
 0x389   : > { %5735 = vmatprep.mubr.msk.bf16.mxu1 %vm3245_vm6, %v6833_v13 }
 0x390   : > { %5736 = vmatmul.mubr.msk.bf16.gmra.mrb[160].mxu1 %vm3245_vm6, %v6831_v12 }
 0x391   : > { %5739 = vmatprep.mubr.msk.bf16.mxu1 %vm3245_vm6, %v6845_v33 }
 0x398   : > { %5740 = vmatmul.mubr.msk.bf16.gmra.mrb[164].mxu1 %vm3245_vm6, %v6843_v32 }
 0x399   : > { %5743 = vmatprep.mubr.msk.bf16.mxu1 %vm3245_vm6, %v6857_v51 }
 0x3a0   : > { %5744 = vmatmul.mubr.msk.bf16.gmra.mrb[168].mxu1 %vm3245_vm6, %v6855_v50 }
 0x3a1   : > { %5747 = vmatprep.mubr.msk.bf16.mxu1 %vm3245_vm6, %v6869_v61 }
 0x3a3   : > { %v5637_v2 = vpop.f32.mrb[64].mxu1 }
 0x3a4   : > { %4130 = vst.msk [vmem:[%s6975_s28 + $0x10] sm:$0xff] %vm1395_vm4, %v5637_v2  ;;  %v3873_v15 = vpop.f32.mrb[65].mxu1 }
 0x3a5   : > { %4128 = vst.msk [vmem:[%s6975_s28] sm:$0xff] %vm1395_vm4, %v3873_v15  ;;  %v5638_v16 = vpop.f32.mrb[66].mxu1 }
 0x3a6   : > { %4131 = vst.msk [vmem:[%s6975_s28 + $0x18] sm:$0xff] %vm1395_vm4, %v5638_v16  ;;  %v3876_v30 = vpop.f32.mrb[67].mxu1 }
 0x3a7   : > { %4129 = vst.msk [vmem:[%s6975_s28 + $0x8] sm:$0xff] %vm1395_vm4, %v3876_v30 }
 0x3a8   : > { %5748 = vmatmul.mubr.msk.bf16.gmra.mrb[172].mxu1 %vm3245_vm6, %v6867_v5 }
 0x3a9   : > { %5751 = vmatprep.mubr.msk.bf16.mxu1 %vm3245_vm6, %v6881_v28 }
 0x3ab   : > { %v5641_v31 = vpop.f32.mrb[68].mxu1 }
 0x3ac   : > { %4134 = vst.msk [vmem:[%s6975_s28 + $0x30] sm:$0xff] %vm1395_vm4, %v5641_v31  ;;  %v3889_v43 = vpop.f32.mrb[69].mxu1 }
 0x3ad   : > { %4132 = vst.msk [vmem:[%s6975_s28 + $0x20] sm:$0xff] %vm1395_vm4, %v3889_v43  ;;  %v5642_v44 = vpop.f32.mrb[70].mxu1 }
 0x3ae   : > { %4135 = vst.msk [vmem:[%s6975_s28 + $0x38] sm:$0xff] %vm1395_vm4, %v5642_v44  ;;  %v3892_v59 = vpop.f32.mrb[71].mxu1 }
 0x3af   : > { %4133 = vst.msk [vmem:[%s6975_s28 + $0x28] sm:$0xff] %vm1395_vm4, %v3892_v59 }
 0x3b0   : > { %5752 = vmatmul.mubr.msk.bf16.gmra.mrb[176].mxu1 %vm3245_vm6, %v6879_v27 }
 0x3b1   : > { %5755 = vmatprep.mubr.msk.bf16.mxu1 %vm3245_vm6, %v6893_v53 }
 0x3b3   : > { %v5645_v60 = vpop.f32.mrb[72].mxu1 }
 0x3b4   : > { %4138 = vst.msk [vmem:[%s6975_s28 + $0x50] sm:$0xff] %vm1395_vm4, %v5645_v60  ;;  %v3905_v8 = vpop.f32.mrb[73].mxu1 }
 0x3b5   : > { %4136 = vst.msk [vmem:[%s6975_s28 + $0x40] sm:$0xff] %vm1395_vm4, %v3905_v8  ;;  %v5646_v9 = vpop.f32.mrb[74].mxu1 }
 0x3b6   : > { %4139 = vst.msk [vmem:[%s6975_s28 + $0x58] sm:$0xff] %vm1395_vm4, %v5646_v9  ;;  %v3908_v25 = vpop.f32.mrb[75].mxu1 }
 0x3b7   : > { %4137 = vst.msk [vmem:[%s6975_s28 + $0x48] sm:$0xff] %vm1395_vm4, %v3908_v25 }
 0x3b8   : > { %5756 = vmatmul.mubr.msk.bf16.gmra.mrb[180].mxu1 %vm3245_vm6, %v6891_v49 }
 0x3b9   : > { %5759 = vmatprep.mubr.msk.bf16.mxu1 %vm3245_vm6, %v6905_v10 }
 0x3bb   : > { %v5649_v26 = vpop.f32.mrb[76].mxu1 }
 0x3bc   : > { %4142 = vst.msk [vmem:[%s6975_s28 + $0x70] sm:$0xff] %vm1395_vm4, %v5649_v26  ;;  %v3921_v40 = vpop.f32.mrb[77].mxu1 }
 0x3bd   : > { %4140 = vst.msk [vmem:[%s6975_s28 + $0x60] sm:$0xff] %vm1395_vm4, %v3921_v40  ;;  %v5650_v41 = vpop.f32.mrb[78].mxu1 }
 0x3be   : > { %4143 = vst.msk [vmem:[%s6975_s28 + $0x78] sm:$0xff] %vm1395_vm4, %v5650_v41  ;;  %v3924_v58 = vpop.f32.mrb[79].mxu1 }
 0x3bf   : > { %4141 = vst.msk [vmem:[%s6975_s28 + $0x68] sm:$0xff] %vm1395_vm4, %v3924_v58 }
 0x3c0   : > { %5760 = vmatmul.mubr.msk.bf16.gmra.mrb[184].mxu1 %vm3245_vm6, %v6903_v7 }
 0x3c1   : > { %5763 = vmatprep.mubr.msk.bf16.mxu1 %vm3245_vm6, %v6917_v11 }
 0x3c3   : > { %v5653_v45 = vpop.f32.mrb[80].mxu1 }
 0x3c4   : > { %4146 = vst.msk [vmem:[%s6975_s28 + $0x90] sm:$0xff] %vm1395_vm4, %v5653_v45  ;;  %v3937_v12 = vpop.f32.mrb[81].mxu1 }
 0x3c5   : > { %4144 = vst.msk [vmem:[%s6975_s28 + $0x80] sm:$0xff] %vm1395_vm4, %v3937_v12  ;;  %v5654_v13 = vpop.f32.mrb[82].mxu1 }
 0x3c6   : > { %4147 = vst.msk [vmem:[%s6975_s28 + $0x98] sm:$0xff] %vm1395_vm4, %v5654_v13  ;;  %v3940_v32 = vpop.f32.mrb[83].mxu1 }
 0x3c7   : > { %4145 = vst.msk [vmem:[%s6975_s28 + $0x88] sm:$0xff] %vm1395_vm4, %v3940_v32 }
 0x3c8   : > { %5764 = vmatmul.mubr.msk.bf16.gmra.mrb[188].mxu1 %vm3245_vm6, %v6915_v36 }
 0x3cb   : > { %v5657_v33 = vpop.f32.mrb[84].mxu1 }
 0x3cc   : > { %4150 = vst.msk [vmem:[%s6975_s28 + $0xb0] sm:$0xff] %vm1395_vm4, %v5657_v33  ;;  %v3953_v50 = vpop.f32.mrb[85].mxu1 }
 0x3cd   : > { %4148 = vst.msk [vmem:[%s6975_s28 + $0xa0] sm:$0xff] %vm1395_vm4, %v3953_v50  ;;  %v5658_v51 = vpop.f32.mrb[86].mxu1 }
 0x3ce   : > { %4151 = vst.msk [vmem:[%s6975_s28 + $0xb8] sm:$0xff] %vm1395_vm4, %v5658_v51  ;;  %v3956_v5 = vpop.f32.mrb[87].mxu1 }
 0x3cf   : > { %4149 = vst.msk [vmem:[%s6975_s28 + $0xa8] sm:$0xff] %vm1395_vm4, %v3956_v5 }
 0x3d3   : > { %v5661_v61 = vpop.f32.mrb[88].mxu1 }
 0x3d4   : > { %4154 = vst.msk [vmem:[%s6975_s28 + $0xd0] sm:$0xff] %vm1395_vm4, %v5661_v61  ;;  %v3969_v27 = vpop.f32.mrb[89].mxu1 }
 0x3d5   : > { %4152 = vst.msk [vmem:[%s6975_s28 + $0xc0] sm:$0xff] %vm1395_vm4, %v3969_v27  ;;  %v5662_v28 = vpop.f32.mrb[90].mxu1 }
 0x3d6   : > { %4155 = vst.msk [vmem:[%s6975_s28 + $0xd8] sm:$0xff] %vm1395_vm4, %v5662_v28  ;;  %v3972_v37 = vpop.f32.mrb[91].mxu1 }
 0x3d7   : > { %4153 = vst.msk [vmem:[%s6975_s28 + $0xc8] sm:$0xff] %vm1395_vm4, %v3972_v37 }
 0x3db   : > { %v5665_v38 = vpop.f32.mrb[92].mxu1 }
 0x3dc   : > { %4158 = vst.msk [vmem:[%s6975_s28 + $0xf0] sm:$0xff] %vm1395_vm4, %v5665_v38  ;;  %v3985_v39 = vpop.f32.mrb[93].mxu1 }
 0x3dd   : > { %4156 = vst.msk [vmem:[%s6975_s28 + $0xe0] sm:$0xff] %vm1395_vm4, %v3985_v39  ;;  %v5666_v42 = vpop.f32.mrb[94].mxu1 }
 0x3de   : > { %4159 = vst.msk [vmem:[%s6975_s28 + $0xf8] sm:$0xff] %vm1395_vm4, %v5666_v42  ;;  %v3988_v46 = vpop.f32.mrb[95].mxu1 }
 0x3df   : > { %4157 = vst.msk [vmem:[%s6975_s28 + $0xe8] sm:$0xff] %vm1395_vm4, %v3988_v46 }
 0x3e3   : > { %v5669_v47 = vpop.f32.mrb[96].mxu1 }
 0x3e4   : > { %4162 = vst.msk [vmem:[%s6975_s28 + $0x110] sm:$0xff] %vm1395_vm4, %v5669_v47  ;;  %v4001_v48 = vpop.f32.mrb[97].mxu1 }
 0x3e5   : > { %4160 = vst.msk [vmem:[%s6975_s28 + $0x100] sm:$0xff] %vm1395_vm4, %v4001_v48  ;;  %v5670_v49 = vpop.f32.mrb[98].mxu1 }
 0x3e6   : > { %4163 = vst.msk [vmem:[%s6975_s28 + $0x118] sm:$0xff] %vm1395_vm4, %v5670_v49  ;;  %v4004_v53 = vpop.f32.mrb[99].mxu1 }
 0x3e7   : > { %4161 = vst.msk [vmem:[%s6975_s28 + $0x108] sm:$0xff] %vm1395_vm4, %v4004_v53 }
 0x3eb   : > { %v5673_v54 = vpop.f32.mrb[100].mxu1 }
 0x3ec   : > { %4166 = vst.msk [vmem:[%s6975_s28 + $0x130] sm:$0xff] %vm1395_vm4, %v5673_v54  ;;  %v4017_v55 = vpop.f32.mrb[101].mxu1 }
 0x3ed   : > { %4164 = vst.msk [vmem:[%s6975_s28 + $0x120] sm:$0xff] %vm1395_vm4, %v4017_v55  ;;  %v5674_v56 = vpop.f32.mrb[102].mxu1 }
 0x3ee   : > { %4167 = vst.msk [vmem:[%s6975_s28 + $0x138] sm:$0xff] %vm1395_vm4, %v5674_v56  ;;  %v4020_v57 = vpop.f32.mrb[103].mxu1 }
 0x3ef   : > { %4165 = vst.msk [vmem:[%s6975_s28 + $0x128] sm:$0xff] %vm1395_vm4, %v4020_v57 }
 0x3f3   : > { %v5677_v62 = vpop.f32.mrb[104].mxu1 }
 0x3f4   : > { %4170 = vst.msk [vmem:[%s6975_s28 + $0x150] sm:$0xff] %vm1395_vm4, %v5677_v62  ;;  %v4033_v63 = vpop.f32.mrb[105].mxu1 }
 0x3f5   : > { %4168 = vst.msk [vmem:[%s6975_s28 + $0x140] sm:$0xff] %vm1395_vm4, %v4033_v63  ;;  %v5678_v0 = vpop.f32.mrb[106].mxu1 }
 0x3f6   : > { %4171 = vst.msk [vmem:[%s6975_s28 + $0x158] sm:$0xff] %vm1395_vm4, %v5678_v0  ;;  %v4036_v52 = vpop.f32.mrb[107].mxu1 }
 0x3f7   : > { %4169 = vst.msk [vmem:[%s6975_s28 + $0x148] sm:$0xff] %vm1395_vm4, %v4036_v52 }
 0x3fb   : > { %v5681_v1 = vpop.f32.mrb[108].mxu1 }
 0x3fc   : > { %4174 = vst.msk [vmem:[%s6975_s28 + $0x170] sm:$0xff] %vm1395_vm4, %v5681_v1  ;;  %v4049_v3 = vpop.f32.mrb[109].mxu1 }
 0x3fd   : > { %4172 = vst.msk [vmem:[%s6975_s28 + $0x160] sm:$0xff] %vm1395_vm4, %v4049_v3  ;;  %v5682_v4 = vpop.f32.mrb[110].mxu1 }
 0x3fe   : > { %4175 = vst.msk [vmem:[%s6975_s28 + $0x178] sm:$0xff] %vm1395_vm4, %v5682_v4  ;;  %v4052_v6 = vpop.f32.mrb[111].mxu1 }
 0x3ff   : > { %4173 = vst.msk [vmem:[%s6975_s28 + $0x168] sm:$0xff] %vm1395_vm4, %v4052_v6 }
 0x403   : > { %v5685_v7 = vpop.f32.mrb[112].mxu1 }
 0x404   : > { %4178 = vst.msk [vmem:[%s6975_s28 + $0x190] sm:$0xff] %vm1395_vm4, %v5685_v7  ;;  %v4065_v10 = vpop.f32.mrb[113].mxu1 }
 0x405   : > { %4176 = vst.msk [vmem:[%s6975_s28 + $0x180] sm:$0xff] %vm1395_vm4, %v4065_v10  ;;  %v5686_v14 = vpop.f32.mrb[114].mxu1 }
 0x406   : > { %4179 = vst.msk [vmem:[%s6975_s28 + $0x198] sm:$0xff] %vm1395_vm4, %v5686_v14  ;;  %v4068_v17 = vpop.f32.mrb[115].mxu1 }
 0x407   : > { %4177 = vst.msk [vmem:[%s6975_s28 + $0x188] sm:$0xff] %vm1395_vm4, %v4068_v17 }
 0x40b   : > { %v5689_v18 = vpop.f32.mrb[116].mxu1 }
 0x40c   : > { %4182 = vst.msk [vmem:[%s6975_s28 + $0x1b0] sm:$0xff] %vm1395_vm4, %v5689_v18  ;;  %v4081_v19 = vpop.f32.mrb[117].mxu1 }
 0x40d   : > { %4180 = vst.msk [vmem:[%s6975_s28 + $0x1a0] sm:$0xff] %vm1395_vm4, %v4081_v19  ;;  %v5690_v20 = vpop.f32.mrb[118].mxu1 }
 0x40e   : > { %4183 = vst.msk [vmem:[%s6975_s28 + $0x1b8] sm:$0xff] %vm1395_vm4, %v5690_v20  ;;  %v4084_v21 = vpop.f32.mrb[119].mxu1 }
 0x40f   : > { %4181 = vst.msk [vmem:[%s6975_s28 + $0x1a8] sm:$0xff] %vm1395_vm4, %v4084_v21 }
 0x413   : > { %v5693_v22 = vpop.f32.mrb[120].mxu1 }
 0x414   : > { %4186 = vst.msk [vmem:[%s6975_s28 + $0x1d0] sm:$0xff] %vm1395_vm4, %v5693_v22  ;;  %v4097_v23 = vpop.f32.mrb[121].mxu1 }
 0x415   : > { %4184 = vst.msk [vmem:[%s6975_s28 + $0x1c0] sm:$0xff] %vm1395_vm4, %v4097_v23  ;;  %v5694_v24 = vpop.f32.mrb[122].mxu1 }
 0x416   : > { %4187 = vst.msk [vmem:[%s6975_s28 + $0x1d8] sm:$0xff] %vm1395_vm4, %v5694_v24  ;;  %v4100_v29 = vpop.f32.mrb[123].mxu1 }
 0x417   : > { %4185 = vst.msk [vmem:[%s6975_s28 + $0x1c8] sm:$0xff] %vm1395_vm4, %v4100_v29 }
 0x41b   : > { %v5697_v34 = vpop.f32.mrb[124].mxu1 }
 0x41c   : > { %4190 = vst.msk [vmem:[%s6975_s28 + $0x1f0] sm:$0xff] %vm1395_vm4, %v5697_v34  ;;  %v4113_v35 = vpop.f32.mrb[125].mxu1 }
 0x41d   : > { %4188 = vst.msk [vmem:[%s6975_s28 + $0x1e0] sm:$0xff] %vm1395_vm4, %v4113_v35  ;;  %v5698_v36 = vpop.f32.mrb[126].mxu1 }
 0x41e   : > { %4191 = vst.msk [vmem:[%s6975_s28 + $0x1f8] sm:$0xff] %vm1395_vm4, %v5698_v36  ;;  %v4116_v11 = vpop.f32.mrb[127].mxu1 }
 0x41f   : > { %4189 = vst.msk [vmem:[%s6975_s28 + $0x1e8] sm:$0xff] %vm1395_vm4, %v4116_v11 }
 0x423   : > { %v5705_v2 = vpop.f32.mrb[128].mxu1 }
 0x424   : > { %4500 = vst.msk [vmem:[%s7128_s16 + $0x10] sm:$0xff] %vm4497_vm7, %v5705_v2  ;;  %v4242_v15 = vpop.f32.mrb[129].mxu1 }
 0x425   : > { %4498 = vst.msk [vmem:[%s7128_s16] sm:$0xff] %vm4497_vm7, %v4242_v15  ;;  %v5706_v16 = vpop.f32.mrb[130].mxu1 }
 0x426   : > { %4501 = vst.msk [vmem:[%s7128_s16 + $0x18] sm:$0xff] %vm4497_vm7, %v5706_v16  ;;  %v4245_v30 = vpop.f32.mrb[131].mxu1 }
 0x427   : > { %4499 = vst.msk [vmem:[%s7128_s16 + $0x8] sm:$0xff] %vm4497_vm7, %v4245_v30 }
 0x42b   : > { %v5709_v31 = vpop.f32.mrb[132].mxu1 }
 0x42c   : > { %4504 = vst.msk [vmem:[%s7128_s16 + $0x30] sm:$0xff] %vm4497_vm7, %v5709_v31  ;;  %v4258_v43 = vpop.f32.mrb[133].mxu1 }
 0x42d   : > { %4502 = vst.msk [vmem:[%s7128_s16 + $0x20] sm:$0xff] %vm4497_vm7, %v4258_v43  ;;  %v5710_v44 = vpop.f32.mrb[134].mxu1 }
 0x42e   : > { %4505 = vst.msk [vmem:[%s7128_s16 + $0x38] sm:$0xff] %vm4497_vm7, %v5710_v44  ;;  %v4261_v59 = vpop.f32.mrb[135].mxu1 }
 0x42f   : > { %4503 = vst.msk [vmem:[%s7128_s16 + $0x28] sm:$0xff] %vm4497_vm7, %v4261_v59 }
 0x433   : > { %v5713_v60 = vpop.f32.mrb[136].mxu1 }
 0x434   : > { %4508 = vst.msk [vmem:[%s7128_s16 + $0x50] sm:$0xff] %vm4497_vm7, %v5713_v60  ;;  %v4274_v8 = vpop.f32.mrb[137].mxu1 }
 0x435   : > { %4506 = vst.msk [vmem:[%s7128_s16 + $0x40] sm:$0xff] %vm4497_vm7, %v4274_v8  ;;  %v5714_v9 = vpop.f32.mrb[138].mxu1 }
 0x436   : > { %4509 = vst.msk [vmem:[%s7128_s16 + $0x58] sm:$0xff] %vm4497_vm7, %v5714_v9  ;;  %v4277_v25 = vpop.f32.mrb[139].mxu1 }
 0x437   : > { %4507 = vst.msk [vmem:[%s7128_s16 + $0x48] sm:$0xff] %vm4497_vm7, %v4277_v25 }
 0x43b   : > { %v5717_v26 = vpop.f32.mrb[140].mxu1 }
 0x43c   : > { %4512 = vst.msk [vmem:[%s7128_s16 + $0x70] sm:$0xff] %vm4497_vm7, %v5717_v26  ;;  %v4290_v40 = vpop.f32.mrb[141].mxu1 }
 0x43d   : > { %4510 = vst.msk [vmem:[%s7128_s16 + $0x60] sm:$0xff] %vm4497_vm7, %v4290_v40  ;;  %v5718_v41 = vpop.f32.mrb[142].mxu1 }
 0x43e   : > { %4513 = vst.msk [vmem:[%s7128_s16 + $0x78] sm:$0xff] %vm4497_vm7, %v5718_v41  ;;  %v4293_v58 = vpop.f32.mrb[143].mxu1 }
 0x43f   : > { %4511 = vst.msk [vmem:[%s7128_s16 + $0x68] sm:$0xff] %vm4497_vm7, %v4293_v58 }
 0x443   : > { %v5721_v45 = vpop.f32.mrb[144].mxu1 }
 0x444   : > { %4516 = vst.msk [vmem:[%s7128_s16 + $0x90] sm:$0xff] %vm4497_vm7, %v5721_v45  ;;  %v4306_v12 = vpop.f32.mrb[145].mxu1 }
 0x445   : > { %4514 = vst.msk [vmem:[%s7128_s16 + $0x80] sm:$0xff] %vm4497_vm7, %v4306_v12  ;;  %v5722_v13 = vpop.f32.mrb[146].mxu1 }
 0x446   : > { %4517 = vst.msk [vmem:[%s7128_s16 + $0x98] sm:$0xff] %vm4497_vm7, %v5722_v13  ;;  %v4309_v32 = vpop.f32.mrb[147].mxu1 }
 0x447   : > { %4515 = vst.msk [vmem:[%s7128_s16 + $0x88] sm:$0xff] %vm4497_vm7, %v4309_v32 }
 0x44b   : > { %v5725_v33 = vpop.f32.mrb[148].mxu1 }
 0x44c   : > { %4520 = vst.msk [vmem:[%s7128_s16 + $0xb0] sm:$0xff] %vm4497_vm7, %v5725_v33  ;;  %v4322_v50 = vpop.f32.mrb[149].mxu1 }
 0x44d   : > { %4518 = vst.msk [vmem:[%s7128_s16 + $0xa0] sm:$0xff] %vm4497_vm7, %v4322_v50  ;;  %v5726_v51 = vpop.f32.mrb[150].mxu1 }
 0x44e   : > { %4521 = vst.msk [vmem:[%s7128_s16 + $0xb8] sm:$0xff] %vm4497_vm7, %v5726_v51  ;;  %v4325_v5 = vpop.f32.mrb[151].mxu1 }
 0x44f   : > { %4519 = vst.msk [vmem:[%s7128_s16 + $0xa8] sm:$0xff] %vm4497_vm7, %v4325_v5 }
 0x453   : > { %v5729_v61 = vpop.f32.mrb[152].mxu1 }
 0x454   : > { %4524 = vst.msk [vmem:[%s7128_s16 + $0xd0] sm:$0xff] %vm4497_vm7, %v5729_v61  ;;  %v4338_v27 = vpop.f32.mrb[153].mxu1 }
 0x455   : > { %4522 = vst.msk [vmem:[%s7128_s16 + $0xc0] sm:$0xff] %vm4497_vm7, %v4338_v27  ;;  %v5730_v28 = vpop.f32.mrb[154].mxu1 }
 0x456   : > { %4525 = vst.msk [vmem:[%s7128_s16 + $0xd8] sm:$0xff] %vm4497_vm7, %v5730_v28  ;;  %v4341_v37 = vpop.f32.mrb[155].mxu1 }
 0x457   : > { %4523 = vst.msk [vmem:[%s7128_s16 + $0xc8] sm:$0xff] %vm4497_vm7, %v4341_v37 }
 0x45b   : > { %v5733_v38 = vpop.f32.mrb[156].mxu1 }
 0x45c   : > { %4528 = vst.msk [vmem:[%s7128_s16 + $0xf0] sm:$0xff] %vm4497_vm7, %v5733_v38  ;;  %v4354_v39 = vpop.f32.mrb[157].mxu1 }
 0x45d   : > { %4526 = vst.msk [vmem:[%s7128_s16 + $0xe0] sm:$0xff] %vm4497_vm7, %v4354_v39  ;;  %v5734_v42 = vpop.f32.mrb[158].mxu1 }
 0x45e   : > { %4529 = vst.msk [vmem:[%s7128_s16 + $0xf8] sm:$0xff] %vm4497_vm7, %v5734_v42  ;;  %v4357_v46 = vpop.f32.mrb[159].mxu1 }
 0x45f   : > { %4527 = vst.msk [vmem:[%s7128_s16 + $0xe8] sm:$0xff] %vm4497_vm7, %v4357_v46 }
 0x463   : > { %v5737_v47 = vpop.f32.mrb[160].mxu1 }
 0x464   : > { %4532 = vst.msk [vmem:[%s7128_s16 + $0x110] sm:$0xff] %vm4497_vm7, %v5737_v47  ;;  %v4370_v48 = vpop.f32.mrb[161].mxu1 }
 0x465   : > { %4530 = vst.msk [vmem:[%s7128_s16 + $0x100] sm:$0xff] %vm4497_vm7, %v4370_v48  ;;  %v5738_v49 = vpop.f32.mrb[162].mxu1 }
 0x466   : > { %4533 = vst.msk [vmem:[%s7128_s16 + $0x118] sm:$0xff] %vm4497_vm7, %v5738_v49  ;;  %v4373_v53 = vpop.f32.mrb[163].mxu1 }
 0x467   : > { %4531 = vst.msk [vmem:[%s7128_s16 + $0x108] sm:$0xff] %vm4497_vm7, %v4373_v53 }
 0x46b   : > { %v5741_v54 = vpop.f32.mrb[164].mxu1 }
 0x46c   : > { %4536 = vst.msk [vmem:[%s7128_s16 + $0x130] sm:$0xff] %vm4497_vm7, %v5741_v54  ;;  %v4386_v55 = vpop.f32.mrb[165].mxu1 }
 0x46d   : > { %4534 = vst.msk [vmem:[%s7128_s16 + $0x120] sm:$0xff] %vm4497_vm7, %v4386_v55  ;;  %v5742_v56 = vpop.f32.mrb[166].mxu1 }
 0x46e   : > { %4537 = vst.msk [vmem:[%s7128_s16 + $0x138] sm:$0xff] %vm4497_vm7, %v5742_v56  ;;  %v4389_v57 = vpop.f32.mrb[167].mxu1 }
 0x46f   : > { %4535 = vst.msk [vmem:[%s7128_s16 + $0x128] sm:$0xff] %vm4497_vm7, %v4389_v57 }
 0x473   : > { %v5745_v62 = vpop.f32.mrb[168].mxu1 }
 0x474   : > { %4540 = vst.msk [vmem:[%s7128_s16 + $0x150] sm:$0xff] %vm4497_vm7, %v5745_v62  ;;  %v4402_v63 = vpop.f32.mrb[169].mxu1 }
 0x475   : > { %4538 = vst.msk [vmem:[%s7128_s16 + $0x140] sm:$0xff] %vm4497_vm7, %v4402_v63  ;;  %v5746_v0 = vpop.f32.mrb[170].mxu1 }
 0x476   : > { %4541 = vst.msk [vmem:[%s7128_s16 + $0x158] sm:$0xff] %vm4497_vm7, %v5746_v0  ;;  %v4405_v52 = vpop.f32.mrb[171].mxu1 }
 0x477   : > { %4539 = vst.msk [vmem:[%s7128_s16 + $0x148] sm:$0xff] %vm4497_vm7, %v4405_v52 }
 0x47b   : > { %v5749_v1 = vpop.f32.mrb[172].mxu1 }
 0x47c   : > { %4544 = vst.msk [vmem:[%s7128_s16 + $0x170] sm:$0xff] %vm4497_vm7, %v5749_v1  ;;  %v4418_v3 = vpop.f32.mrb[173].mxu1 }
 0x47d   : > { %4542 = vst.msk [vmem:[%s7128_s16 + $0x160] sm:$0xff] %vm4497_vm7, %v4418_v3  ;;  %v5750_v4 = vpop.f32.mrb[174].mxu1 }
 0x47e   : > { %4545 = vst.msk [vmem:[%s7128_s16 + $0x178] sm:$0xff] %vm4497_vm7, %v5750_v4  ;;  %v4421_v6 = vpop.f32.mrb[175].mxu1 }
 0x47f   : > { %4543 = vst.msk [vmem:[%s7128_s16 + $0x168] sm:$0xff] %vm4497_vm7, %v4421_v6 }
 0x483   : > { %v5753_v7 = vpop.f32.mrb[176].mxu1 }
 0x484   : > { %4548 = vst.msk [vmem:[%s7128_s16 + $0x190] sm:$0xff] %vm4497_vm7, %v5753_v7  ;;  %v4434_v10 = vpop.f32.mrb[177].mxu1 }
 0x485   : > { %4546 = vst.msk [vmem:[%s7128_s16 + $0x180] sm:$0xff] %vm4497_vm7, %v4434_v10  ;;  %v5754_v14 = vpop.f32.mrb[178].mxu1 }
 0x486   : > { %4549 = vst.msk [vmem:[%s7128_s16 + $0x198] sm:$0xff] %vm4497_vm7, %v5754_v14  ;;  %v4437_v17 = vpop.f32.mrb[179].mxu1 }
 0x487   : > { %4547 = vst.msk [vmem:[%s7128_s16 + $0x188] sm:$0xff] %vm4497_vm7, %v4437_v17 }
 0x48b   : > { %v5757_v18 = vpop.f32.mrb[180].mxu1 }
 0x48c   : > { %4552 = vst.msk [vmem:[%s7128_s16 + $0x1b0] sm:$0xff] %vm4497_vm7, %v5757_v18  ;;  %v4450_v19 = vpop.f32.mrb[181].mxu1 }
 0x48d   : > { %4550 = vst.msk [vmem:[%s7128_s16 + $0x1a0] sm:$0xff] %vm4497_vm7, %v4450_v19  ;;  %v5758_v20 = vpop.f32.mrb[182].mxu1 }
 0x48e   : > { %4553 = vst.msk [vmem:[%s7128_s16 + $0x1b8] sm:$0xff] %vm4497_vm7, %v5758_v20  ;;  %v4453_v21 = vpop.f32.mrb[183].mxu1 }
 0x48f   : > { %4551 = vst.msk [vmem:[%s7128_s16 + $0x1a8] sm:$0xff] %vm4497_vm7, %v4453_v21 }
 0x493   : > { %v5761_v22 = vpop.f32.mrb[184].mxu1 }
 0x494   : > { %4556 = vst.msk [vmem:[%s7128_s16 + $0x1d0] sm:$0xff] %vm4497_vm7, %v5761_v22  ;;  %v4466_v23 = vpop.f32.mrb[185].mxu1 }
 0x495   : > { %4554 = vst.msk [vmem:[%s7128_s16 + $0x1c0] sm:$0xff] %vm4497_vm7, %v4466_v23  ;;  %v5762_v24 = vpop.f32.mrb[186].mxu1 }
 0x496   : > { %4557 = vst.msk [vmem:[%s7128_s16 + $0x1d8] sm:$0xff] %vm4497_vm7, %v5762_v24  ;;  %v4469_v29 = vpop.f32.mrb[187].mxu1 }
 0x497   : > { %4555 = vst.msk [vmem:[%s7128_s16 + $0x1c8] sm:$0xff] %vm4497_vm7, %v4469_v29 }
 0x49b   : > { %v5765_v34 = vpop.f32.mrb[188].mxu1 }
 0x49c   : > { %4560 = vst.msk [vmem:[%s7128_s16 + $0x1f0] sm:$0xff] %vm4497_vm7, %v5765_v34  ;;  %v4482_v35 = vpop.f32.mrb[189].mxu1 }
 0x49d   : > { %4558 = vst.msk [vmem:[%s7128_s16 + $0x1e0] sm:$0xff] %vm4497_vm7, %v4482_v35  ;;  %v5766_v36 = vpop.f32.mrb[190].mxu1 }
 0x49e   : > { %4561 = vst.msk [vmem:[%s7128_s16 + $0x1f8] sm:$0xff] %vm4497_vm7, %v5766_v36  ;;  %v4485_v11 = vpop.f32.mrb[191].mxu1 }
 0x49f   : > { %4559 = vst.msk [vmem:[%s7128_s16 + $0x1e8] sm:$0xff] %vm4497_vm7, %v4485_v11 }
 0x4a0 PF: > { %s25_s29 = sadd.s32 1, %s6178_s29  }
 0x4a1   : > { %p22_p4 = scmp.ge.s32.totalorder %s25_s29, 4  }
 0x4a3   :  { %24 = sbr.rel (!%p22_p4) target bundleno = 1 (0x1), region = 123 }

</bundles_post_ra>
